<compile_context>
chip_gen: v7x
topology: tpu7x:2x2x1
jax: 0.10.0
libtpu: 0.0.40
codegen_flags: <defaults>
</compile_context>

<pallas_src>
import jax
import jax.numpy as jnp
from jax import lax
from jax.experimental import pallas as pl
from jax.experimental.pallas import tpu as pltpu


# ----------------------------- fused Pallas kernel -----------------------------

def make_fused_kernel(n_layer, T, B, H, C):
    """Builds the fused LSTM-stack + classifier kernel for static shapes."""

    def kernel(x_ref, *args):
        # args layout: [wih_0, whh_0, b_0, ..., wih_{L-1}, whh_{L-1}, b_{L-1},
        #               cls_w, cls_b, out_ref, gx_sc]
        wrefs = args[:3 * n_layer]
        cls_w_ref = args[3 * n_layer]
        cls_b_ref = args[3 * n_layer + 1]
        out_ref = args[3 * n_layer + 2]
        gx_sc = args[3 * n_layer + 3]

        # ---- Hoist recurrent weights out of the step loop (vreg-resident). ----
        whh = [wrefs[3 * l + 1][...] for l in range(n_layer)]        # (H, 4H)
        wih = [None] + [wrefs[3 * l + 0][...] for l in range(1, n_layer)]  # (H, 4H)
        # Pre-broadcast layer>=1 biases once (JAX does not CSE broadcasts in loops).
        bias = [None] + [jnp.broadcast_to(wrefs[3 * l + 2][...], (B, 4 * H))
                         for l in range(1, n_layer)]

        # ---- Layer-0 input projection for ALL timesteps: one big matmul. ----
        gx_sc[...] = (jnp.dot(x_ref[...], wrefs[0][...],
                              preferred_element_type=jnp.float32)
                      + wrefs[2][...])

        def lstm_cell(gates, c_prev):
            # Gate layout [i, f, o, g]: one wide sigmoid + one tanh.
            sig = jax.nn.sigmoid(gates[:, :3 * H])
            i_g = sig[:, 0 * H:1 * H]
            f_g = sig[:, 1 * H:2 * H]
            o_g = sig[:, 2 * H:3 * H]
            g_g = jnp.tanh(gates[:, 3 * H:4 * H])
            c_new = f_g * c_prev + i_g * g_g
            h_new = o_g * jnp.tanh(c_new)
            return h_new, c_new

        # ---- Wavefront over (time, layer): layer l runs step t = k - l. ----
        h = [jnp.zeros((B, H), jnp.float32) for _ in range(n_layer)]
        c = [jnp.zeros((B, H), jnp.float32) for _ in range(n_layer)]

        for k in range(T + n_layer - 1):
            # Descending layer order: layer l reads h[l-1] from the PREVIOUS
            # wavefront (not yet overwritten in this one), which is exactly
            # h_{l-1}[t] for its own step t = k - l.
            for l in reversed(range(n_layer)):
                t = k - l
                if not (0 <= t < T):
                    continue
                if l == 0:
                    gates = (gx_sc[pl.ds(t * B, B), :]
                             + jnp.dot(h[0], whh[0],
                                       preferred_element_type=jnp.float32))
                else:
                    gates = (jnp.dot(h[l - 1], wih[l],
                                     preferred_element_type=jnp.float32)
                             + jnp.dot(h[l], whh[l],
                                       preferred_element_type=jnp.float32)
                             + bias[l])
                h[l], c[l] = lstm_cell(gates, c[l])

        # ---- Classifier epilogue on the top layer's last-timestep hidden. ----
        out_ref[...] = (jnp.dot(h[n_layer - 1], cls_w_ref[...],
                                preferred_element_type=jnp.float32)
                        + cls_b_ref[...]).astype(out_ref.dtype)

    return kernel


# --------------------------------- wrapper ---------------------------------

@jax.jit
def rnn_lstm_forward(x, kparams):
    """Equivalent of RnnLstm.forward. x: (B, T, in_dim) -> (B, n_class)."""
    B, T, D = x.shape
    layers = kparams["lstm"]
    n_layer = len(layers)
    H = layers[0]["w_hh_t"].shape[0]
    C = kparams["cls_w_t"].shape[1]

    # Time-major, flattened to (T*B, D) so the layer-0 projection is one matmul.
    x_tm = jnp.transpose(x, (1, 0, 2)).reshape(T * B, D).astype(jnp.float32)

    flat_w = []
    for layer in layers:
        flat_w += [layer["w_ih_t"], layer["w_hh_t"], layer["b2"]]
    flat_w += [kparams["cls_w_t"], kparams["cls_b2"]]

    kernel = make_fused_kernel(n_layer=n_layer, T=T, B=B, H=H, C=C)

    # Single invocation, everything VMEM-resident: no grid, no BlockSpecs, so
    # there is no (useless) double-buffering of the inputs.
    return pl.pallas_call(
        kernel,
        out_shape=jax.ShapeDtypeStruct((B, C), jnp.float32),
        scratch_shapes=[
            pltpu.VMEM((T * B, 4 * H), jnp.float32),  # layer-0 pre-projected gates
        ],
    )(x_tm, *flat_w)


# ------------------------- deterministic parameters -------------------------

def init_torch_params(key, in_dim, hidden_dim, n_layer, n_class):
    """Raw PyTorch-layout parameters (gate order [i, f, g, o])."""
    raw = {"lstm": []}
    stdv = 1.0 / jnp.sqrt(hidden_dim)
    for l in range(n_layer):
        d_in = in_dim if l == 0 else hidden_dim
        key, k1, k2, k3, k4 = jax.random.split(key, 5)
        raw["lstm"].append({
            "w_ih": jax.random.uniform(k1, (4 * hidden_dim, d_in),
                                       minval=-stdv, maxval=stdv,
                                       dtype=jnp.float32),
            "w_hh": jax.random.uniform(k2, (4 * hidden_dim, hidden_dim),
                                       minval=-stdv, maxval=stdv,
                                       dtype=jnp.float32),
            "b_ih": jax.random.uniform(k3, (4 * hidden_dim,),
                                       minval=-stdv, maxval=stdv,
                                       dtype=jnp.float32),
            "b_hh": jax.random.uniform(k4, (4 * hidden_dim,),
                                       minval=-stdv, maxval=stdv,
                                       dtype=jnp.float32),
        })
    key, k1, k2 = jax.random.split(key, 3)
    bound = 1.0 / jnp.sqrt(hidden_dim)
    raw["cls_w"] = jax.random.uniform(k1, (n_class, hidden_dim),
                                      minval=-bound, maxval=bound,
                                      dtype=jnp.float32)
    raw["cls_b"] = jax.random.uniform(k2, (n_class,),
                                      minval=-bound, maxval=bound,
                                      dtype=jnp.float32)
    return raw


def prepare_kernel_params(raw):
    """Transpose weights, fold biases, and permute gates [i,f,g,o] -> [i,f,o,g]."""
    def reorder(m):
        i, f, g, o = jnp.split(m, 4, axis=-1)
        return jnp.concatenate([i, f, o, g], axis=-1)

    kp = {"lstm": []}
    for layer in raw["lstm"]:
        kp["lstm"].append({
            "w_ih_t": reorder(layer["w_ih"].T),                         # (Din, 4H)
            "w_hh_t": reorder(layer["w_hh"].T),                         # (H, 4H)
            "b2": reorder((layer["b_ih"] + layer["b_hh"])[None, :]),    # (1, 4H)
        })
    kp["cls_w_t"] = raw["cls_w"].T                                      # (H, C)
    kp["cls_b2"] = raw["cls_b"][None, :]                                # (1, C)
    return kp


# ---------------------------- pure-JAX reference ----------------------------

def rnn_lstm_reference(x, raw):
    """Reference with PyTorch semantics (gate order [i, f, g, o])."""
    h_seq = jnp.transpose(x, (1, 0, 2)).astype(jnp.float32)  # (T, B, D)
    for layer in raw["lstm"]:
        w_ih, w_hh = layer["w_ih"], layer["w_hh"]
        b_ih, b_hh = layer["b_ih"], layer["b_hh"]
        H = w_hh.shape[1]
        B = h_seq.shape[1]

        def step(carry, x_t, w_ih=w_ih, w_hh=w_hh, b_ih=b_ih, b_hh=b_hh, H=H):
            h, c = carry
            gates = x_t @ w_ih.T + h @ w_hh.T + b_ih + b_hh
            i = jax.nn.sigmoid(gates[:, 0 * H:1 * H])
            f = jax.nn.sigmoid(gates[:, 1 * H:2 * H])
            g = jnp.tanh(gates[:, 2 * H:3 * H])
            o = jax.nn.sigmoid(gates[:, 3 * H:4 * H])
            c = f * c + i * g
            h = o * jnp.tanh(c)
            return (h, c), h

        init = (jnp.zeros((B, H), jnp.float32), jnp.zeros((B, H), jnp.float32))
        _, h_seq = lax.scan(step, init, h_seq)
    return h_seq[-1] @ raw["cls_w"].T + raw["cls_b"]


# ----------------------------------- main -----------------------------------

if __name__ == "__main__":
    B, T, IN_DIM, HIDDEN, N_LAYER, N_CLASS = 8, 8, 16, 32, 2, 10

    key = jax.random.PRNGKey(0)
    key_x, key_p = jax.random.split(key)
    x = jax.random.normal(key_x, (B, T, IN_DIM), dtype=jnp.float32)

    raw = init_torch_params(key_p, IN_DIM, HIDDEN, N_LAYER, N_CLASS)
    kparams = prepare_kernel_params(raw)

    out = jax.block_until_ready(rnn_lstm_forward(x, kparams))
    ref = jax.block_until_ready(rnn_lstm_reference(x, raw))

    assert out.shape == (B, N_CLASS)
    assert jnp.allclose(out, ref, atol=1e-4, rtol=1e-4), (
        f"max err {jnp.max(jnp.abs(out - ref))}")

    print("KERNEL_OK")
</pallas_src>

<mosaic_0001>
module attributes {stable_mosaic.version = 11 : i64} {
  func.func @kernel(%arg0: memref<64x16xf32, #tpu.memory_space<vmem>>, %arg1: memref<16x128xf32, #tpu.memory_space<vmem>>, %arg2: memref<32x128xf32, #tpu.memory_space<vmem>>, %arg3: memref<1x128xf32, #tpu.memory_space<vmem>>, %arg4: memref<32x128xf32, #tpu.memory_space<vmem>>, %arg5: memref<32x128xf32, #tpu.memory_space<vmem>>, %arg6: memref<1x128xf32, #tpu.memory_space<vmem>>, %arg7: memref<32x10xf32, #tpu.memory_space<vmem>>, %arg8: memref<1x10xf32, #tpu.memory_space<vmem>>, %arg9: memref<8x10xf32, #tpu.memory_space<vmem>>, %arg10: memref<64x128xf32, #tpu.memory_space<vmem>>) attributes {dimension_semantics = [], scalar_prefetch = 0 : i64, scratch_operands = 1 : i64, tpu.core_type = #tpu.core_type<tc>} {
    %c0 = arith.constant 0 : index
    %c0_0 = arith.constant 0 : index
    %0 = vector.load %arg2[%c0, %c0_0] : memref<32x128xf32, #tpu.memory_space<vmem>>, vector<32x128xf32>
    %c0_1 = arith.constant 0 : index
    %c0_2 = arith.constant 0 : index
    %1 = vector.load %arg5[%c0_1, %c0_2] : memref<32x128xf32, #tpu.memory_space<vmem>>, vector<32x128xf32>
    %c0_3 = arith.constant 0 : index
    %c0_4 = arith.constant 0 : index
    %2 = vector.load %arg4[%c0_3, %c0_4] : memref<32x128xf32, #tpu.memory_space<vmem>>, vector<32x128xf32>
    %c0_5 = arith.constant 0 : index
    %c0_6 = arith.constant 0 : index
    %3 = vector.load %arg6[%c0_5, %c0_6] : memref<1x128xf32, #tpu.memory_space<vmem>>, vector<1x128xf32>
    %4 = vector.shape_cast %3 : vector<1x128xf32> to vector<1x128xf32>
    %5 = vector.broadcast %4 : vector<1x128xf32> to vector<8x128xf32>
    %c0_7 = arith.constant 0 : index
    %c0_8 = arith.constant 0 : index
    %6 = vector.load %arg0[%c0_7, %c0_8] : memref<64x16xf32, #tpu.memory_space<vmem>>, vector<64x16xf32>
    %c0_9 = arith.constant 0 : index
    %c0_10 = arith.constant 0 : index
    %7 = vector.load %arg1[%c0_9, %c0_10] : memref<16x128xf32, #tpu.memory_space<vmem>>, vector<16x128xf32>
    %cst = arith.constant dense<0.000000e+00> : vector<64x128xf32>
    %8 = tpu.matmul %6, %7, %cst {dimension_numbers = #tpu.dot_dimension_numbers<[1], [0], [0], [1], [0, 0, 1, 1], [], []>} : vector<64x16xf32>, vector<16x128xf32>, vector<64x128xf32> -> vector<64x128xf32>
    %c0_11 = arith.constant 0 : index
    %c0_12 = arith.constant 0 : index
    %9 = vector.load %arg3[%c0_11, %c0_12] : memref<1x128xf32, #tpu.memory_space<vmem>>, vector<1x128xf32>
    %10 = vector.broadcast %9 : vector<1x128xf32> to vector<64x128xf32>
    %11 = arith.addf %8, %10 : vector<64x128xf32>
    %c0_13 = arith.constant 0 : index
    %c0_14 = arith.constant 0 : index
    %12 = vector.load %arg10[%c0_13, %c0_14] : memref<64x128xf32, #tpu.memory_space<vmem>>, vector<64x128xf32>
    tpu.vector_store %arg10[%c0_13, %c0_14], %11 {strides = array<i32>} : memref<64x128xf32, #tpu.memory_space<vmem>>, vector<64x128xf32>,
    %cst_15 = arith.constant 0.000000e+00 : f32
    %13 = vector.broadcast %cst_15 : f32 to vector<8x32xf32>
    %cst_16 = arith.constant 0.000000e+00 : f32
    %14 = vector.broadcast %cst_16 : f32 to vector<8x32xf32>
    %cst_17 = arith.constant 0.000000e+00 : f32
    %15 = vector.broadcast %cst_17 : f32 to vector<8x32xf32>
    %cst_18 = arith.constant 0.000000e+00 : f32
    %16 = vector.broadcast %cst_18 : f32 to vector<8x32xf32>
    %c0_19 = arith.constant 0 : index
    %c0_20 = arith.constant 0 : index
    %17 = vector.load %arg10[%c0_19, %c0_20] : memref<64x128xf32, #tpu.memory_space<vmem>>, vector<8x128xf32>
    %cst_21 = arith.constant dense<0.000000e+00> : vector<8x128xf32>
    %18 = tpu.matmul %13, %0, %cst_21 {dimension_numbers = #tpu.dot_dimension_numbers<[1], [0], [0], [1], [0, 0, 1, 1], [], []>} : vector<8x32xf32>, vector<32x128xf32>, vector<8x128xf32> -> vector<8x128xf32>
    %19 = arith.addf %17, %18 : vector<8x128xf32>
    %20 = vector.extract_strided_slice %19 {offsets = [0, 0], sizes = [8, 96], strides = [1, 1]} : vector<8x128xf32> to vector<8x96xf32>
    %21 = arith.negf %20 : vector<8x96xf32>
    %22 = math.exp %21 : vector<8x96xf32>
    %cst_22 = arith.constant 1.000000e+00 : f32
    %23 = vector.broadcast %cst_22 : f32 to vector<8x96xf32>
    %24 = arith.addf %23, %22 : vector<8x96xf32>
    %25 = arith.divf %23, %24 : vector<8x96xf32>
    %26 = vector.extract_strided_slice %25 {offsets = [0, 0], sizes = [8, 32], strides = [1, 1]} : vector<8x96xf32> to vector<8x32xf32>
    %27 = vector.extract_strided_slice %25 {offsets = [0, 32], sizes = [8, 32], strides = [1, 1]} : vector<8x96xf32> to vector<8x32xf32>
    %28 = vector.extract_strided_slice %25 {offsets = [0, 64], sizes = [8, 32], strides = [1, 1]} : vector<8x96xf32> to vector<8x32xf32>
    %29 = vector.extract_strided_slice %19 {offsets = [0, 96], sizes = [8, 32], strides = [1, 1]} : vector<8x128xf32> to vector<8x32xf32>
    %30 = math.tanh %29 : vector<8x32xf32>
    %31 = arith.mulf %27, %15 : vector<8x32xf32>
    %32 = arith.mulf %26, %30 : vector<8x32xf32>
    %33 = arith.addf %31, %32 : vector<8x32xf32>
    %34 = math.tanh %33 : vector<8x32xf32>
    %35 = arith.mulf %28, %34 : vector<8x32xf32>
    %cst_23 = arith.constant dense<0.000000e+00> : vector<8x128xf32>
    %36 = tpu.matmul %35, %2, %cst_23 {dimension_numbers = #tpu.dot_dimension_numbers<[1], [0], [0], [1], [0, 0, 1, 1], [], []>} : vector<8x32xf32>, vector<32x128xf32>, vector<8x128xf32> -> vector<8x128xf32>
    %cst_24 = arith.constant dense<0.000000e+00> : vector<8x128xf32>
    %37 = tpu.matmul %14, %1, %cst_24 {dimension_numbers = #tpu.dot_dimension_numbers<[1], [0], [0], [1], [0, 0, 1, 1], [], []>} : vector<8x32xf32>, vector<32x128xf32>, vector<8x128xf32> -> vector<8x128xf32>
    %38 = arith.addf %36, %37 : vector<8x128xf32>
    %39 = arith.addf %38, %5 : vector<8x128xf32>
    %40 = vector.extract_strided_slice %39 {offsets = [0, 0], sizes = [8, 96], strides = [1, 1]} : vector<8x128xf32> to vector<8x96xf32>
    %41 = arith.negf %40 : vector<8x96xf32>
    %42 = math.exp %41 : vector<8x96xf32>
    %cst_25 = arith.constant 1.000000e+00 : f32
    %43 = vector.broadcast %cst_25 : f32 to vector<8x96xf32>
    %44 = arith.addf %43, %42 : vector<8x96xf32>
    %45 = arith.divf %43, %44 : vector<8x96xf32>
    %46 = vector.extract_strided_slice %45 {offsets = [0, 0], sizes = [8, 32], strides = [1, 1]} : vector<8x96xf32> to vector<8x32xf32>
    %47 = vector.extract_strided_slice %45 {offsets = [0, 32], sizes = [8, 32], strides = [1, 1]} : vector<8x96xf32> to vector<8x32xf32>
    %48 = vector.extract_strided_slice %45 {offsets = [0, 64], sizes = [8, 32], strides = [1, 1]} : vector<8x96xf32> to vector<8x32xf32>
    %49 = vector.extract_strided_slice %39 {offsets = [0, 96], sizes = [8, 32], strides = [1, 1]} : vector<8x128xf32> to vector<8x32xf32>
    %50 = math.tanh %49 : vector<8x32xf32>
    %51 = arith.mulf %47, %16 : vector<8x32xf32>
    %52 = arith.mulf %46, %50 : vector<8x32xf32>
    %53 = arith.addf %51, %52 : vector<8x32xf32>
    %54 = math.tanh %53 : vector<8x32xf32>
    %55 = arith.mulf %48, %54 : vector<8x32xf32>
    %c8 = arith.constant 8 : index
    %c0_26 = arith.constant 0 : index
    %56 = vector.load %arg10[%c8, %c0_26] : memref<64x128xf32, #tpu.memory_space<vmem>>, vector<8x128xf32>
    %cst_27 = arith.constant dense<0.000000e+00> : vector<8x128xf32>
    %57 = tpu.matmul %35, %0, %cst_27 {dimension_numbers = #tpu.dot_dimension_numbers<[1], [0], [0], [1], [0, 0, 1, 1], [], []>} : vector<8x32xf32>, vector<32x128xf32>, vector<8x128xf32> -> vector<8x128xf32>
    %58 = arith.addf %56, %57 : vector<8x128xf32>
    %59 = vector.extract_strided_slice %58 {offsets = [0, 0], sizes = [8, 96], strides = [1, 1]} : vector<8x128xf32> to vector<8x96xf32>
    %60 = arith.negf %59 : vector<8x96xf32>
    %61 = math.exp %60 : vector<8x96xf32>
    %cst_28 = arith.constant 1.000000e+00 : f32
    %62 = vector.broadcast %cst_28 : f32 to vector<8x96xf32>
    %63 = arith.addf %62, %61 : vector<8x96xf32>
    %64 = arith.divf %62, %63 : vector<8x96xf32>
    %65 = vector.extract_strided_slice %64 {offsets = [0, 0], sizes = [8, 32], strides = [1, 1]} : vector<8x96xf32> to vector<8x32xf32>
    %66 = vector.extract_strided_slice %64 {offsets = [0, 32], sizes = [8, 32], strides = [1, 1]} : vector<8x96xf32> to vector<8x32xf32>
    %67 = vector.extract_strided_slice %64 {offsets = [0, 64], sizes = [8, 32], strides = [1, 1]} : vector<8x96xf32> to vector<8x32xf32>
    %68 = vector.extract_strided_slice %58 {offsets = [0, 96], sizes = [8, 32], strides = [1, 1]} : vector<8x128xf32> to vector<8x32xf32>
    %69 = math.tanh %68 : vector<8x32xf32>
    %70 = arith.mulf %66, %33 : vector<8x32xf32>
    %71 = arith.mulf %65, %69 : vector<8x32xf32>
    %72 = arith.addf %70, %71 : vector<8x32xf32>
    %73 = math.tanh %72 : vector<8x32xf32>
    %74 = arith.mulf %67, %73 : vector<8x32xf32>
    %cst_29 = arith.constant dense<0.000000e+00> : vector<8x128xf32>
    %75 = tpu.matmul %74, %2, %cst_29 {dimension_numbers = #tpu.dot_dimension_numbers<[1], [0], [0], [1], [0, 0, 1, 1], [], []>} : vector<8x32xf32>, vector<32x128xf32>, vector<8x128xf32> -> vector<8x128xf32>
    %cst_30 = arith.constant dense<0.000000e+00> : vector<8x128xf32>
    %76 = tpu.matmul %55, %1, %cst_30 {dimension_numbers = #tpu.dot_dimension_numbers<[1], [0], [0], [1], [0, 0, 1, 1], [], []>} : vector<8x32xf32>, vector<32x128xf32>, vector<8x128xf32> -> vector<8x128xf32>
    %77 = arith.addf %75, %76 : vector<8x128xf32>
    %78 = arith.addf %77, %5 : vector<8x128xf32>
    %79 = vector.extract_strided_slice %78 {offsets = [0, 0], sizes = [8, 96], strides = [1, 1]} : vector<8x128xf32> to vector<8x96xf32>
    %80 = arith.negf %79 : vector<8x96xf32>
    %81 = math.exp %80 : vector<8x96xf32>
    %cst_31 = arith.constant 1.000000e+00 : f32
    %82 = vector.broadcast %cst_31 : f32 to vector<8x96xf32>
    %83 = arith.addf %82, %81 : vector<8x96xf32>
    %84 = arith.divf %82, %83 : vector<8x96xf32>
    %85 = vector.extract_strided_slice %84 {offsets = [0, 0], sizes = [8, 32], strides = [1, 1]} : vector<8x96xf32> to vector<8x32xf32>
    %86 = vector.extract_strided_slice %84 {offsets = [0, 32], sizes = [8, 32], strides = [1, 1]} : vector<8x96xf32> to vector<8x32xf32>
    %87 = vector.extract_strided_slice %84 {offsets = [0, 64], sizes = [8, 32], strides = [1, 1]} : vector<8x96xf32> to vector<8x32xf32>
    %88 = vector.extract_strided_slice %78 {offsets = [0, 96], sizes = [8, 32], strides = [1, 1]} : vector<8x128xf32> to vector<8x32xf32>
    %89 = math.tanh %88 : vector<8x32xf32>
    %90 = arith.mulf %86, %53 : vector<8x32xf32>
    %91 = arith.mulf %85, %89 : vector<8x32xf32>
    %92 = arith.addf %90, %91 : vector<8x32xf32>
    %93 = math.tanh %92 : vector<8x32xf32>
    %94 = arith.mulf %87, %93 : vector<8x32xf32>
    %c16 = arith.constant 16 : index
    %c0_32 = arith.constant 0 : index
    %95 = vector.load %arg10[%c16, %c0_32] : memref<64x128xf32, #tpu.memory_space<vmem>>, vector<8x128xf32>
    %cst_33 = arith.constant dense<0.000000e+00> : vector<8x128xf32>
    %96 = tpu.matmul %74, %0, %cst_33 {dimension_numbers = #tpu.dot_dimension_numbers<[1], [0], [0], [1], [0, 0, 1, 1], [], []>} : vector<8x32xf32>, vector<32x128xf32>, vector<8x128xf32> -> vector<8x128xf32>
    %97 = arith.addf %95, %96 : vector<8x128xf32>
    %98 = vector.extract_strided_slice %97 {offsets = [0, 0], sizes = [8, 96], strides = [1, 1]} : vector<8x128xf32> to vector<8x96xf32>
    %99 = arith.negf %98 : vector<8x96xf32>
    %100 = math.exp %99 : vector<8x96xf32>
    %cst_34 = arith.constant 1.000000e+00 : f32
    %101 = vector.broadcast %cst_34 : f32 to vector<8x96xf32>
    %102 = arith.addf %101, %100 : vector<8x96xf32>
    %103 = arith.divf %101, %102 : vector<8x96xf32>
    %104 = vector.extract_strided_slice %103 {offsets = [0, 0], sizes = [8, 32], strides = [1, 1]} : vector<8x96xf32> to vector<8x32xf32>
    %105 = vector.extract_strided_slice %103 {offsets = [0, 32], sizes = [8, 32], strides = [1, 1]} : vector<8x96xf32> to vector<8x32xf32>
    %106 = vector.extract_strided_slice %103 {offsets = [0, 64], sizes = [8, 32], strides = [1, 1]} : vector<8x96xf32> to vector<8x32xf32>
    %107 = vector.extract_strided_slice %97 {offsets = [0, 96], sizes = [8, 32], strides = [1, 1]} : vector<8x128xf32> to vector<8x32xf32>
    %108 = math.tanh %107 : vector<8x32xf32>
    %109 = arith.mulf %105, %72 : vector<8x32xf32>
    %110 = arith.mulf %104, %108 : vector<8x32xf32>
    %111 = arith.addf %109, %110 : vector<8x32xf32>
    %112 = math.tanh %111 : vector<8x32xf32>
    %113 = arith.mulf %106, %112 : vector<8x32xf32>
    %cst_35 = arith.constant dense<0.000000e+00> : vector<8x128xf32>
    %114 = tpu.matmul %113, %2, %cst_35 {dimension_numbers = #tpu.dot_dimension_numbers<[1], [0], [0], [1], [0, 0, 1, 1], [], []>} : vector<8x32xf32>, vector<32x128xf32>, vector<8x128xf32> -> vector<8x128xf32>
    %cst_36 = arith.constant dense<0.000000e+00> : vector<8x128xf32>
    %115 = tpu.matmul %94, %1, %cst_36 {dimension_numbers = #tpu.dot_dimension_numbers<[1], [0], [0], [1], [0, 0, 1, 1], [], []>} : vector<8x32xf32>, vector<32x128xf32>, vector<8x128xf32> -> vector<8x128xf32>
    %116 = arith.addf %114, %115 : vector<8x128xf32>
    %117 = arith.addf %116, %5 : vector<8x128xf32>
    %118 = vector.extract_strided_slice %117 {offsets = [0, 0], sizes = [8, 96], strides = [1, 1]} : vector<8x128xf32> to vector<8x96xf32>
    %119 = arith.negf %118 : vector<8x96xf32>
    %120 = math.exp %119 : vector<8x96xf32>
    %cst_37 = arith.constant 1.000000e+00 : f32
    %121 = vector.broadcast %cst_37 : f32 to vector<8x96xf32>
    %122 = arith.addf %121, %120 : vector<8x96xf32>
    %123 = arith.divf %121, %122 : vector<8x96xf32>
    %124 = vector.extract_strided_slice %123 {offsets = [0, 0], sizes = [8, 32], strides = [1, 1]} : vector<8x96xf32> to vector<8x32xf32>
    %125 = vector.extract_strided_slice %123 {offsets = [0, 32], sizes = [8, 32], strides = [1, 1]} : vector<8x96xf32> to vector<8x32xf32>
    %126 = vector.extract_strided_slice %123 {offsets = [0, 64], sizes = [8, 32], strides = [1, 1]} : vector<8x96xf32> to vector<8x32xf32>
    %127 = vector.extract_strided_slice %117 {offsets = [0, 96], sizes = [8, 32], strides = [1, 1]} : vector<8x128xf32> to vector<8x32xf32>
    %128 = math.tanh %127 : vector<8x32xf32>
    %129 = arith.mulf %125, %92 : vector<8x32xf32>
    %130 = arith.mulf %124, %128 : vector<8x32xf32>
    %131 = arith.addf %129, %130 : vector<8x32xf32>
    %132 = math.tanh %131 : vector<8x32xf32>
    %133 = arith.mulf %126, %132 : vector<8x32xf32>
    %c24 = arith.constant 24 : index
    %c0_38 = arith.constant 0 : index
    %134 = vector.load %arg10[%c24, %c0_38] : memref<64x128xf32, #tpu.memory_space<vmem>>, vector<8x128xf32>
    %cst_39 = arith.constant dense<0.000000e+00> : vector<8x128xf32>
    %135 = tpu.matmul %113, %0, %cst_39 {dimension_numbers = #tpu.dot_dimension_numbers<[1], [0], [0], [1], [0, 0, 1, 1], [], []>} : vector<8x32xf32>, vector<32x128xf32>, vector<8x128xf32> -> vector<8x128xf32>
    %136 = arith.addf %134, %135 : vector<8x128xf32>
    %137 = vector.extract_strided_slice %136 {offsets = [0, 0], sizes = [8, 96], strides = [1, 1]} : vector<8x128xf32> to vector<8x96xf32>
    %138 = arith.negf %137 : vector<8x96xf32>
    %139 = math.exp %138 : vector<8x96xf32>
    %cst_40 = arith.constant 1.000000e+00 : f32
    %140 = vector.broadcast %cst_40 : f32 to vector<8x96xf32>
    %141 = arith.addf %140, %139 : vector<8x96xf32>
    %142 = arith.divf %140, %141 : vector<8x96xf32>
    %143 = vector.extract_strided_slice %142 {offsets = [0, 0], sizes = [8, 32], strides = [1, 1]} : vector<8x96xf32> to vector<8x32xf32>
    %144 = vector.extract_strided_slice %142 {offsets = [0, 32], sizes = [8, 32], strides = [1, 1]} : vector<8x96xf32> to vector<8x32xf32>
    %145 = vector.extract_strided_slice %142 {offsets = [0, 64], sizes = [8, 32], strides = [1, 1]} : vector<8x96xf32> to vector<8x32xf32>
    %146 = vector.extract_strided_slice %136 {offsets = [0, 96], sizes = [8, 32], strides = [1, 1]} : vector<8x128xf32> to vector<8x32xf32>
    %147 = math.tanh %146 : vector<8x32xf32>
    %148 = arith.mulf %144, %111 : vector<8x32xf32>
    %149 = arith.mulf %143, %147 : vector<8x32xf32>
    %150 = arith.addf %148, %149 : vector<8x32xf32>
    %151 = math.tanh %150 : vector<8x32xf32>
    %152 = arith.mulf %145, %151 : vector<8x32xf32>
    %cst_41 = arith.constant dense<0.000000e+00> : vector<8x128xf32>
    %153 = tpu.matmul %152, %2, %cst_41 {dimension_numbers = #tpu.dot_dimension_numbers<[1], [0], [0], [1], [0, 0, 1, 1], [], []>} : vector<8x32xf32>, vector<32x128xf32>, vector<8x128xf32> -> vector<8x128xf32>
    %cst_42 = arith.constant dense<0.000000e+00> : vector<8x128xf32>
    %154 = tpu.matmul %133, %1, %cst_42 {dimension_numbers = #tpu.dot_dimension_numbers<[1], [0], [0], [1], [0, 0, 1, 1], [], []>} : vector<8x32xf32>, vector<32x128xf32>, vector<8x128xf32> -> vector<8x128xf32>
    %155 = arith.addf %153, %154 : vector<8x128xf32>
    %156 = arith.addf %155, %5 : vector<8x128xf32>
    %157 = vector.extract_strided_slice %156 {offsets = [0, 0], sizes = [8, 96], strides = [1, 1]} : vector<8x128xf32> to vector<8x96xf32>
    %158 = arith.negf %157 : vector<8x96xf32>
    %159 = math.exp %158 : vector<8x96xf32>
    %cst_43 = arith.constant 1.000000e+00 : f32
    %160 = vector.broadcast %cst_43 : f32 to vector<8x96xf32>
    %161 = arith.addf %160, %159 : vector<8x96xf32>
    %162 = arith.divf %160, %161 : vector<8x96xf32>
    %163 = vector.extract_strided_slice %162 {offsets = [0, 0], sizes = [8, 32], strides = [1, 1]} : vector<8x96xf32> to vector<8x32xf32>
    %164 = vector.extract_strided_slice %162 {offsets = [0, 32], sizes = [8, 32], strides = [1, 1]} : vector<8x96xf32> to vector<8x32xf32>
    %165 = vector.extract_strided_slice %162 {offsets = [0, 64], sizes = [8, 32], strides = [1, 1]} : vector<8x96xf32> to vector<8x32xf32>
    %166 = vector.extract_strided_slice %156 {offsets = [0, 96], sizes = [8, 32], strides = [1, 1]} : vector<8x128xf32> to vector<8x32xf32>
    %167 = math.tanh %166 : vector<8x32xf32>
    %168 = arith.mulf %164, %131 : vector<8x32xf32>
    %169 = arith.mulf %163, %167 : vector<8x32xf32>
    %170 = arith.addf %168, %169 : vector<8x32xf32>
    %171 = math.tanh %170 : vector<8x32xf32>
    %172 = arith.mulf %165, %171 : vector<8x32xf32>
    %c32 = arith.constant 32 : index
    %c0_44 = arith.constant 0 : index
    %173 = vector.load %arg10[%c32, %c0_44] : memref<64x128xf32, #tpu.memory_space<vmem>>, vector<8x128xf32>
    %cst_45 = arith.constant dense<0.000000e+00> : vector<8x128xf32>
    %174 = tpu.matmul %152, %0, %cst_45 {dimension_numbers = #tpu.dot_dimension_numbers<[1], [0], [0], [1], [0, 0, 1, 1], [], []>} : vector<8x32xf32>, vector<32x128xf32>, vector<8x128xf32> -> vector<8x128xf32>
    %175 = arith.addf %173, %174 : vector<8x128xf32>
    %176 = vector.extract_strided_slice %175 {offsets = [0, 0], sizes = [8, 96], strides = [1, 1]} : vector<8x128xf32> to vector<8x96xf32>
    %177 = arith.negf %176 : vector<8x96xf32>
    %178 = math.exp %177 : vector<8x96xf32>
    %cst_46 = arith.constant 1.000000e+00 : f32
    %179 = vector.broadcast %cst_46 : f32 to vector<8x96xf32>
    %180 = arith.addf %179, %178 : vector<8x96xf32>
    %181 = arith.divf %179, %180 : vector<8x96xf32>
    %182 = vector.extract_strided_slice %181 {offsets = [0, 0], sizes = [8, 32], strides = [1, 1]} : vector<8x96xf32> to vector<8x32xf32>
    %183 = vector.extract_strided_slice %181 {offsets = [0, 32], sizes = [8, 32], strides = [1, 1]} : vector<8x96xf32> to vector<8x32xf32>
    %184 = vector.extract_strided_slice %181 {offsets = [0, 64], sizes = [8, 32], strides = [1, 1]} : vector<8x96xf32> to vector<8x32xf32>
    %185 = vector.extract_strided_slice %175 {offsets = [0, 96], sizes = [8, 32], strides = [1, 1]} : vector<8x128xf32> to vector<8x32xf32>
    %186 = math.tanh %185 : vector<8x32xf32>
    %187 = arith.mulf %183, %150 : vector<8x32xf32>
    %188 = arith.mulf %182, %186 : vector<8x32xf32>
    %189 = arith.addf %187, %188 : vector<8x32xf32>
    %190 = math.tanh %189 : vector<8x32xf32>
    %191 = arith.mulf %184, %190 : vector<8x32xf32>
    %cst_47 = arith.constant dense<0.000000e+00> : vector<8x128xf32>
    %192 = tpu.matmul %191, %2, %cst_47 {dimension_numbers = #tpu.dot_dimension_numbers<[1], [0], [0], [1], [0, 0, 1, 1], [], []>} : vector<8x32xf32>, vector<32x128xf32>, vector<8x128xf32> -> vector<8x128xf32>
    %cst_48 = arith.constant dense<0.000000e+00> : vector<8x128xf32>
    %193 = tpu.matmul %172, %1, %cst_48 {dimension_numbers = #tpu.dot_dimension_numbers<[1], [0], [0], [1], [0, 0, 1, 1], [], []>} : vector<8x32xf32>, vector<32x128xf32>, vector<8x128xf32> -> vector<8x128xf32>
    %194 = arith.addf %192, %193 : vector<8x128xf32>
    %195 = arith.addf %194, %5 : vector<8x128xf32>
    %196 = vector.extract_strided_slice %195 {offsets = [0, 0], sizes = [8, 96], strides = [1, 1]} : vector<8x128xf32> to vector<8x96xf32>
    %197 = arith.negf %196 : vector<8x96xf32>
    %198 = math.exp %197 : vector<8x96xf32>
    %cst_49 = arith.constant 1.000000e+00 : f32
    %199 = vector.broadcast %cst_49 : f32 to vector<8x96xf32>
    %200 = arith.addf %199, %198 : vector<8x96xf32>
    %201 = arith.divf %199, %200 : vector<8x96xf32>
    %202 = vector.extract_strided_slice %201 {offsets = [0, 0], sizes = [8, 32], strides = [1, 1]} : vector<8x96xf32> to vector<8x32xf32>
    %203 = vector.extract_strided_slice %201 {offsets = [0, 32], sizes = [8, 32], strides = [1, 1]} : vector<8x96xf32> to vector<8x32xf32>
    %204 = vector.extract_strided_slice %201 {offsets = [0, 64], sizes = [8, 32], strides = [1, 1]} : vector<8x96xf32> to vector<8x32xf32>
    %205 = vector.extract_strided_slice %195 {offsets = [0, 96], sizes = [8, 32], strides = [1, 1]} : vector<8x128xf32> to vector<8x32xf32>
    %206 = math.tanh %205 : vector<8x32xf32>
    %207 = arith.mulf %203, %170 : vector<8x32xf32>
    %208 = arith.mulf %202, %206 : vector<8x32xf32>
    %209 = arith.addf %207, %208 : vector<8x32xf32>
    %210 = math.tanh %209 : vector<8x32xf32>
    %211 = arith.mulf %204, %210 : vector<8x32xf32>
    %c40 = arith.constant 40 : index
    %c0_50 = arith.constant 0 : index
    %212 = vector.load %arg10[%c40, %c0_50] : memref<64x128xf32, #tpu.memory_space<vmem>>, vector<8x128xf32>
    %cst_51 = arith.constant dense<0.000000e+00> : vector<8x128xf32>
    %213 = tpu.matmul %191, %0, %cst_51 {dimension_numbers = #tpu.dot_dimension_numbers<[1], [0], [0], [1], [0, 0, 1, 1], [], []>} : vector<8x32xf32>, vector<32x128xf32>, vector<8x128xf32> -> vector<8x128xf32>
    %214 = arith.addf %212, %213 : vector<8x128xf32>
    %215 = vector.extract_strided_slice %214 {offsets = [0, 0], sizes = [8, 96], strides = [1, 1]} : vector<8x128xf32> to vector<8x96xf32>
    %216 = arith.negf %215 : vector<8x96xf32>
    %217 = math.exp %216 : vector<8x96xf32>
    %cst_52 = arith.constant 1.000000e+00 : f32
    %218 = vector.broadcast %cst_52 : f32 to vector<8x96xf32>
    %219 = arith.addf %218, %217 : vector<8x96xf32>
    %220 = arith.divf %218, %219 : vector<8x96xf32>
    %221 = vector.extract_strided_slice %220 {offsets = [0, 0], sizes = [8, 32], strides = [1, 1]} : vector<8x96xf32> to vector<8x32xf32>
    %222 = vector.extract_strided_slice %220 {offsets = [0, 32], sizes = [8, 32], strides = [1, 1]} : vector<8x96xf32> to vector<8x32xf32>
    %223 = vector.extract_strided_slice %220 {offsets = [0, 64], sizes = [8, 32], strides = [1, 1]} : vector<8x96xf32> to vector<8x32xf32>
    %224 = vector.extract_strided_slice %214 {offsets = [0, 96], sizes = [8, 32], strides = [1, 1]} : vector<8x128xf32> to vector<8x32xf32>
    %225 = math.tanh %224 : vector<8x32xf32>
    %226 = arith.mulf %222, %189 : vector<8x32xf32>
    %227 = arith.mulf %221, %225 : vector<8x32xf32>
    %228 = arith.addf %226, %227 : vector<8x32xf32>
    %229 = math.tanh %228 : vector<8x32xf32>
    %230 = arith.mulf %223, %229 : vector<8x32xf32>
    %cst_53 = arith.constant dense<0.000000e+00> : vector<8x128xf32>
    %231 = tpu.matmul %230, %2, %cst_53 {dimension_numbers = #tpu.dot_dimension_numbers<[1], [0], [0], [1], [0, 0, 1, 1], [], []>} : vector<8x32xf32>, vector<32x128xf32>, vector<8x128xf32> -> vector<8x128xf32>
    %cst_54 = arith.constant dense<0.000000e+00> : vector<8x128xf32>
    %232 = tpu.matmul %211, %1, %cst_54 {dimension_numbers = #tpu.dot_dimension_numbers<[1], [0], [0], [1], [0, 0, 1, 1], [], []>} : vector<8x32xf32>, vector<32x128xf32>, vector<8x128xf32> -> vector<8x128xf32>
    %233 = arith.addf %231, %232 : vector<8x128xf32>
    %234 = arith.addf %233, %5 : vector<8x128xf32>
    %235 = vector.extract_strided_slice %234 {offsets = [0, 0], sizes = [8, 96], strides = [1, 1]} : vector<8x128xf32> to vector<8x96xf32>
    %236 = arith.negf %235 : vector<8x96xf32>
    %237 = math.exp %236 : vector<8x96xf32>
    %cst_55 = arith.constant 1.000000e+00 : f32
    %238 = vector.broadcast %cst_55 : f32 to vector<8x96xf32>
    %239 = arith.addf %238, %237 : vector<8x96xf32>
    %240 = arith.divf %238, %239 : vector<8x96xf32>
    %241 = vector.extract_strided_slice %240 {offsets = [0, 0], sizes = [8, 32], strides = [1, 1]} : vector<8x96xf32> to vector<8x32xf32>
    %242 = vector.extract_strided_slice %240 {offsets = [0, 32], sizes = [8, 32], strides = [1, 1]} : vector<8x96xf32> to vector<8x32xf32>
    %243 = vector.extract_strided_slice %240 {offsets = [0, 64], sizes = [8, 32], strides = [1, 1]} : vector<8x96xf32> to vector<8x32xf32>
    %244 = vector.extract_strided_slice %234 {offsets = [0, 96], sizes = [8, 32], strides = [1, 1]} : vector<8x128xf32> to vector<8x32xf32>
    %245 = math.tanh %244 : vector<8x32xf32>
    %246 = arith.mulf %242, %209 : vector<8x32xf32>
    %247 = arith.mulf %241, %245 : vector<8x32xf32>
    %248 = arith.addf %246, %247 : vector<8x32xf32>
    %249 = math.tanh %248 : vector<8x32xf32>
    %250 = arith.mulf %243, %249 : vector<8x32xf32>
    %c48 = arith.constant 48 : index
    %c0_56 = arith.constant 0 : index
    %251 = vector.load %arg10[%c48, %c0_56] : memref<64x128xf32, #tpu.memory_space<vmem>>, vector<8x128xf32>
    %cst_57 = arith.constant dense<0.000000e+00> : vector<8x128xf32>
    %252 = tpu.matmul %230, %0, %cst_57 {dimension_numbers = #tpu.dot_dimension_numbers<[1], [0], [0], [1], [0, 0, 1, 1], [], []>} : vector<8x32xf32>, vector<32x128xf32>, vector<8x128xf32> -> vector<8x128xf32>
    %253 = arith.addf %251, %252 : vector<8x128xf32>
    %254 = vector.extract_strided_slice %253 {offsets = [0, 0], sizes = [8, 96], strides = [1, 1]} : vector<8x128xf32> to vector<8x96xf32>
    %255 = arith.negf %254 : vector<8x96xf32>
    %256 = math.exp %255 : vector<8x96xf32>
    %cst_58 = arith.constant 1.000000e+00 : f32
    %257 = vector.broadcast %cst_58 : f32 to vector<8x96xf32>
    %258 = arith.addf %257, %256 : vector<8x96xf32>
    %259 = arith.divf %257, %258 : vector<8x96xf32>
    %260 = vector.extract_strided_slice %259 {offsets = [0, 0], sizes = [8, 32], strides = [1, 1]} : vector<8x96xf32> to vector<8x32xf32>
    %261 = vector.extract_strided_slice %259 {offsets = [0, 32], sizes = [8, 32], strides = [1, 1]} : vector<8x96xf32> to vector<8x32xf32>
    %262 = vector.extract_strided_slice %259 {offsets = [0, 64], sizes = [8, 32], strides = [1, 1]} : vector<8x96xf32> to vector<8x32xf32>
    %263 = vector.extract_strided_slice %253 {offsets = [0, 96], sizes = [8, 32], strides = [1, 1]} : vector<8x128xf32> to vector<8x32xf32>
    %264 = math.tanh %263 : vector<8x32xf32>
    %265 = arith.mulf %261, %228 : vector<8x32xf32>
    %266 = arith.mulf %260, %264 : vector<8x32xf32>
    %267 = arith.addf %265, %266 : vector<8x32xf32>
    %268 = math.tanh %267 : vector<8x32xf32>
    %269 = arith.mulf %262, %268 : vector<8x32xf32>
    %cst_59 = arith.constant dense<0.000000e+00> : vector<8x128xf32>
    %270 = tpu.matmul %269, %2, %cst_59 {dimension_numbers = #tpu.dot_dimension_numbers<[1], [0], [0], [1], [0, 0, 1, 1], [], []>} : vector<8x32xf32>, vector<32x128xf32>, vector<8x128xf32> -> vector<8x128xf32>
    %cst_60 = arith.constant dense<0.000000e+00> : vector<8x128xf32>
    %271 = tpu.matmul %250, %1, %cst_60 {dimension_numbers = #tpu.dot_dimension_numbers<[1], [0], [0], [1], [0, 0, 1, 1], [], []>} : vector<8x32xf32>, vector<32x128xf32>, vector<8x128xf32> -> vector<8x128xf32>
    %272 = arith.addf %270, %271 : vector<8x128xf32>
    %273 = arith.addf %272, %5 : vector<8x128xf32>
    %274 = vector.extract_strided_slice %273 {offsets = [0, 0], sizes = [8, 96], strides = [1, 1]} : vector<8x128xf32> to vector<8x96xf32>
    %275 = arith.negf %274 : vector<8x96xf32>
    %276 = math.exp %275 : vector<8x96xf32>
    %cst_61 = arith.constant 1.000000e+00 : f32
    %277 = vector.broadcast %cst_61 : f32 to vector<8x96xf32>
    %278 = arith.addf %277, %276 : vector<8x96xf32>
    %279 = arith.divf %277, %278 : vector<8x96xf32>
    %280 = vector.extract_strided_slice %279 {offsets = [0, 0], sizes = [8, 32], strides = [1, 1]} : vector<8x96xf32> to vector<8x32xf32>
    %281 = vector.extract_strided_slice %279 {offsets = [0, 32], sizes = [8, 32], strides = [1, 1]} : vector<8x96xf32> to vector<8x32xf32>
    %282 = vector.extract_strided_slice %279 {offsets = [0, 64], sizes = [8, 32], strides = [1, 1]} : vector<8x96xf32> to vector<8x32xf32>
    %283 = vector.extract_strided_slice %273 {offsets = [0, 96], sizes = [8, 32], strides = [1, 1]} : vector<8x128xf32> to vector<8x32xf32>
    %284 = math.tanh %283 : vector<8x32xf32>
    %285 = arith.mulf %281, %248 : vector<8x32xf32>
    %286 = arith.mulf %280, %284 : vector<8x32xf32>
    %287 = arith.addf %285, %286 : vector<8x32xf32>
    %288 = math.tanh %287 : vector<8x32xf32>
    %289 = arith.mulf %282, %288 : vector<8x32xf32>
    %c56 = arith.constant 56 : index
    %c0_62 = arith.constant 0 : index
    %290 = vector.load %arg10[%c56, %c0_62] : memref<64x128xf32, #tpu.memory_space<vmem>>, vector<8x128xf32>
    %cst_63 = arith.constant dense<0.000000e+00> : vector<8x128xf32>
    %291 = tpu.matmul %269, %0, %cst_63 {dimension_numbers = #tpu.dot_dimension_numbers<[1], [0], [0], [1], [0, 0, 1, 1], [], []>} : vector<8x32xf32>, vector<32x128xf32>, vector<8x128xf32> -> vector<8x128xf32>
    %292 = arith.addf %290, %291 : vector<8x128xf32>
    %293 = vector.extract_strided_slice %292 {offsets = [0, 0], sizes = [8, 96], strides = [1, 1]} : vector<8x128xf32> to vector<8x96xf32>
    %294 = arith.negf %293 : vector<8x96xf32>
    %295 = math.exp %294 : vector<8x96xf32>
    %cst_64 = arith.constant 1.000000e+00 : f32
    %296 = vector.broadcast %cst_64 : f32 to vector<8x96xf32>
    %297 = arith.addf %296, %295 : vector<8x96xf32>
    %298 = arith.divf %296, %297 : vector<8x96xf32>
    %299 = vector.extract_strided_slice %298 {offsets = [0, 0], sizes = [8, 32], strides = [1, 1]} : vector<8x96xf32> to vector<8x32xf32>
    %300 = vector.extract_strided_slice %298 {offsets = [0, 32], sizes = [8, 32], strides = [1, 1]} : vector<8x96xf32> to vector<8x32xf32>
    %301 = vector.extract_strided_slice %298 {offsets = [0, 64], sizes = [8, 32], strides = [1, 1]} : vector<8x96xf32> to vector<8x32xf32>
    %302 = vector.extract_strided_slice %292 {offsets = [0, 96], sizes = [8, 32], strides = [1, 1]} : vector<8x128xf32> to vector<8x32xf32>
    %303 = math.tanh %302 : vector<8x32xf32>
    %304 = arith.mulf %300, %267 : vector<8x32xf32>
    %305 = arith.mulf %299, %303 : vector<8x32xf32>
    %306 = arith.addf %304, %305 : vector<8x32xf32>
    %307 = math.tanh %306 : vector<8x32xf32>
    %308 = arith.mulf %301, %307 : vector<8x32xf32>
    %cst_65 = arith.constant dense<0.000000e+00> : vector<8x128xf32>
    %309 = tpu.matmul %308, %2, %cst_65 {dimension_numbers = #tpu.dot_dimension_numbers<[1], [0], [0], [1], [0, 0, 1, 1], [], []>} : vector<8x32xf32>, vector<32x128xf32>, vector<8x128xf32> -> vector<8x128xf32>
    %cst_66 = arith.constant dense<0.000000e+00> : vector<8x128xf32>
    %310 = tpu.matmul %289, %1, %cst_66 {dimension_numbers = #tpu.dot_dimension_numbers<[1], [0], [0], [1], [0, 0, 1, 1], [], []>} : vector<8x32xf32>, vector<32x128xf32>, vector<8x128xf32> -> vector<8x128xf32>
    %311 = arith.addf %309, %310 : vector<8x128xf32>
    %312 = arith.addf %311, %5 : vector<8x128xf32>
    %313 = vector.extract_strided_slice %312 {offsets = [0, 0], sizes = [8, 96], strides = [1, 1]} : vector<8x128xf32> to vector<8x96xf32>
    %314 = arith.negf %313 : vector<8x96xf32>
    %315 = math.exp %314 : vector<8x96xf32>
    %cst_67 = arith.constant 1.000000e+00 : f32
    %316 = vector.broadcast %cst_67 : f32 to vector<8x96xf32>
    %317 = arith.addf %316, %315 : vector<8x96xf32>
    %318 = arith.divf %316, %317 : vector<8x96xf32>
    %319 = vector.extract_strided_slice %318 {offsets = [0, 0], sizes = [8, 32], strides = [1, 1]} : vector<8x96xf32> to vector<8x32xf32>
    %320 = vector.extract_strided_slice %318 {offsets = [0, 32], sizes = [8, 32], strides = [1, 1]} : vector<8x96xf32> to vector<8x32xf32>
    %321 = vector.extract_strided_slice %318 {offsets = [0, 64], sizes = [8, 32], strides = [1, 1]} : vector<8x96xf32> to vector<8x32xf32>
    %322 = vector.extract_strided_slice %312 {offsets = [0, 96], sizes = [8, 32], strides = [1, 1]} : vector<8x128xf32> to vector<8x32xf32>
    %323 = math.tanh %322 : vector<8x32xf32>
    %324 = arith.mulf %320, %287 : vector<8x32xf32>
    %325 = arith.mulf %319, %323 : vector<8x32xf32>
    %326 = arith.addf %324, %325 : vector<8x32xf32>
    %327 = math.tanh %326 : vector<8x32xf32>
    %328 = arith.mulf %321, %327 : vector<8x32xf32>
    %c0_68 = arith.constant 0 : index
    %c0_69 = arith.constant 0 : index
    %329 = vector.load %arg7[%c0_68, %c0_69] : memref<32x10xf32, #tpu.memory_space<vmem>>, vector<32x10xf32>
    %cst_70 = arith.constant dense<0.000000e+00> : vector<8x10xf32>
    %330 = tpu.matmul %328, %329, %cst_70 {dimension_numbers = #tpu.dot_dimension_numbers<[1], [0], [0], [1], [0, 0, 1, 1], [], []>} : vector<8x32xf32>, vector<32x10xf32>, vector<8x10xf32> -> vector<8x10xf32>
    %c0_71 = arith.constant 0 : index
    %c0_72 = arith.constant 0 : index
    %331 = vector.load %arg8[%c0_71, %c0_72] : memref<1x10xf32, #tpu.memory_space<vmem>>, vector<1x10xf32>
    %332 = vector.broadcast %331 : vector<1x10xf32> to vector<8x10xf32>
    %333 = arith.addf %330, %332 : vector<8x10xf32>
    %c0_73 = arith.constant 0 : index
    %c0_74 = arith.constant 0 : index
    %334 = vector.load %arg9[%c0_73, %c0_74] : memref<8x10xf32, #tpu.memory_space<vmem>>, vector<8x10xf32>
    tpu.vector_store %arg9[%c0_73, %c0_74], %333 {strides = array<i32>} : memref<8x10xf32, #tpu.memory_space<vmem>>, vector<8x10xf32>,
    return
  }
}

</mosaic_0001>

<bundles_post_ra>
// kernel: rnn_lstm_forward.1
= control target key start
LH: loop header
LB: loop body
LE: loop exit
PB: predicated region body
PF: predicated region fallthrough
CT: control target
= control target key end

     0   :  { %vm69_vm0 = vcmask 130048   ;;  %v3265_v3 = vmov 0.0|0.0   ;;  %vm3266_vm1 = vmmov 0   ;;  %v3267_v10 = vmov 0.0   ;;  %s3772_s0 = inlined_call_operand.vmem [shape: f32[64,16], index: 0, kind: input, shape index: {}]   ;;  %s3773_s1 = inlined_call_operand.vmem [shape: f32[16,128], index: 1, kind: input, shape index: {}]   ;;  %s3774_s2 = inlined_call_operand.vmem [shape: f32[32,128], index: 2, kind: input, shape index: {}]   ;;  %s3775_s3 = inlined_call_operand.vmem [shape: f32[1,128], index: 3, kind: input, shape index: {}]   ;;  %s3776_s4 = inlined_call_operand.vmem [shape: f32[32,128], index: 4, kind: input, shape index: {}]   ;;  %s3777_s5 = inlined_call_operand.vmem [shape: f32[32,128], index: 5, kind: input, shape index: {}]   ;;  %s3778_s6 = inlined_call_operand.vmem [shape: f32[1,128], index: 6, kind: input, shape index: {}]   ;;  %s3779_s7 = inlined_call_operand.vmem [shape: f32[32,10], index: 7, kind: input, shape index: {}]   ;;  %s3780_s8 = inlined_call_operand.vmem [shape: f32[1,10], index: 8, kind: input, shape index: {}]   ;;  %s3781_s9 = inlined_call_operand.hbm [shape: f32[8,10], index: 9, kind: output, shape index: {}]  }
   0x1   :  { %v60_v0 = vld [vmem:[%s3773_s1] sm:$0xff]  ;;  %v61_v1 = vld [vmem:[%s3773_s1 + $0x8] sm:$0xff]  ;;  %2956 = vmatprep.subr.bf16.mxu1 %v3265_v3  ;;  %v35_v8 = vld [vmem:[%s3774_s2 + $0x10] sm:$0xff]  ;;  %2685 = vmatprep.mubr.msk.f32.mxu1 %vm3266_vm1, %v3267_v10 }
   0x2   :  { %v33_v2 = vld [vmem:[%s3774_s2] sm:$0xff]  ;;  %v2952_v4 = vpack.c.bf16 %v61_v1, %v60_v0  ;;  %v34_v5 = vld [vmem:[%s3774_s2 + $0x8] sm:$0xff]  ;;  %v36_v9 = vld [vmem:[%s3774_s2 + $0x18] sm:$0xff] }
   0x3   :  { %v52_v6 = vld [vmem:[%s3772_s0] sm:$0xff]  ;;  %v3337_v7 = vpack.c.bf16 %v34_v5, %v33_v2 }
   0x4   :  { %2665 = vmatprep.mubr.msk.f32.mxu0 %vm69_vm0, %v52_v6 }
   0x5   :  { %14 = vsyncpa [#allocation4], 0  ;;  %2953 = vmatprep.subr.bf16.mxu0 %v2952_v4  ;;  %2958 = vmatpush3.bf16.msra.mxu1 %v3337_v7  ;;  %v53_v11 = vld [vmem:[%s3772_s0 + $0x8] sm:$0xff]  ;;  %v3352_v12 = vpack.c.bf16 %v36_v9, %v35_v8  ;;  %v3365_v13 = vld [vmem:[%s3775_s3] ss:$0 sm:$0xff]  ;;  %s3268_s25 = smov 32  }
   0x6   :  { %2955 = vmatpush3.bf16.msra.mxu0 %v2952_v4  ;;  %2959 = vmatprep.subr.bf16.mxu1 %v3265_v3  ;;  %v41_v30 = vld [vmem:[%s3776_s4] sm:$0xff]  ;;  %v42_v31 = vld [vmem:[%s3776_s4 + $0x8] sm:$0xff]  ;;  %v54_v35 = vld [vmem:[%s3772_s0 + $0x10] sm:$0xff]  ;;  %vm208_vm2 = vcmask 261120   ;;  %vm2460_vm3 = vcmask 80896  }
   0x7   :  { %2968 = vmatprep.subr.bf16.mxu0 %v3265_v3  ;;  %v37_v32 = vld [vmem:[%s3777_s5] sm:$0xff]  ;;  %v3384_v33 = vpack.c.bf16 %v42_v31, %v41_v30  ;;  %v38_v34 = vld [vmem:[%s3777_s5 + $0x8] sm:$0xff]  ;;  %v55_v36 = vld [vmem:[%s3772_s0 + $0x18] sm:$0xff] }
   0x8   :  { %v3395_v37 = vpack.c.bf16 %v38_v34, %v37_v32  ;;  %v39_v38 = vld [vmem:[%s3777_s5 + $0x10] sm:$0xff]  ;;  %v40_v39 = vld [vmem:[%s3777_s5 + $0x18] sm:$0xff]  ;;  %v56_v40 = vld [vmem:[%s3772_s0 + $0x20] sm:$0xff] }
   0x9   :  { %2666 = vmatmul.mubr.msk.f32.vlgmr.msra.gmra.mrb[0].mxu0 %vm69_vm0, %v53_v11  ;;  %2961 = vmatpush3.bf16.msra.mxu1 %v3352_v12  ;;  %v43_v41 = vld [vmem:[%s3776_s4 + $0x10] sm:$0xff]  ;;  %v44_v42 = vld [vmem:[%s3776_s4 + $0x18] sm:$0xff]  ;;  %v3416_v43 = vpack.c.bf16 %v40_v39, %v39_v38  ;;  %v57_v45 = vld [vmem:[%s3772_s0 + $0x28] sm:$0xff] }
   0xa   :  { %2962 = vmatprep.subr.bf16.mxu1 %v3265_v3  ;;  %2668 = vmatprep.mubr.msk.f32.mxu0 %vm69_vm0, %v54_v35  ;;  %v3418_v44 = vpack.c.bf16 %v44_v42, %v43_v41  ;;  %v58_v46 = vld [vmem:[%s3772_s0 + $0x30] sm:$0xff]  ;;  %v59_v47 = vld [vmem:[%s3772_s0 + $0x38] sm:$0xff]  ;;  %s3269_s0 = smov 64   ;;  %v3481_v61 = vld [vmem:[%s3778_s6] ss:$0 sm:$0xff] }
   0xb   :  { %2970 = vmatpush3.bf16.msra.mxu0 %v3384_v33 }
   0xc   :  { %2686 = vmatmul.mubr.f32.vlgmr.msra.gmra.mrb[0].mxu1 %v3267_v10  ;;  %2971 = vmatprep.subr.bf16.mxu0 %v3265_v3 }
   0xd   :  { %2696 = vmatprep.mubr.msk.f32.mxu1 %vm3266_vm1, %v3267_v10  ;;  %2964 = vmatpush3.bf16.msra.mxu1 %v3395_v37 }
   0xe   :  { %2669 = vmatmul.mubr.msk.f32.gmra.mrb[2].mxu0 %vm69_vm0, %v55_v36  ;;  %2965 = vmatprep.subr.bf16.mxu1 %v3265_v3 }
   0xf   :  { %2671 = vmatprep.mubr.msk.f32.mxu0 %vm69_vm0, %v56_v40  ;;  %2973 = vmatpush3.bf16.msra.mxu0 %v3418_v44 }
  0x10   :  { %2980 = vmatprep.subr.bf16.mxu0 %v3265_v3 }
  0x11   :  { %2967 = vmatpush3.bf16.msra.mxu1 %v3416_v43 }
  0x12   :  { %2672 = vmatmul.mubr.msk.f32.gmra.mrb[4].mxu0 %vm69_vm0, %v57_v45  ;;  %2974 = vmatprep.subr.bf16.mxu1 %v3265_v3 }
  0x13   :  { %2674 = vmatprep.mubr.msk.f32.mxu0 %vm69_vm0, %v58_v46 }
  0x14   :  { %2697 = vmatmul.mubr.f32.vlgmr.msra.gmra.mrb[2].mxu1 %v3267_v10 }
  0x15   :  { %2976 = vmatpush3.bf16.msra.mxu1 %v3337_v7  ;;  %2718 = vmatprep.mubr.msk.f32.mxu1 %vm3266_vm1, %v3267_v10 }
  0x16   :  { %2675 = vmatmul.mubr.msk.f32.gmra.mrb[6].mxu0 %vm69_vm0, %v59_v47  ;;  %2977 = vmatprep.subr.bf16.mxu1 %v3265_v3 }
  0x17   :  { %2707 = vmatprep.mubr.msk.f32.mxu0 %vm3266_vm1, %v3267_v10 }
  0x19   :  { %2979 = vmatpush3.bf16.msra.mxu1 %v3352_v12 }
  0x1a   :  { %2986 = vmatprep.subr.bf16.mxu1 %v3265_v3 }
  0xdc   :  { %v3367_v14 = vpop.f32.mrb[0].mxu0 }
  0xdd   :  { %v160_v15 = vpop.f32.mrb[1].mxu0  ;;  %v166_v60 = vadd.f32 %v3367_v14, %v3365_v13 }
  0xde   :  { %v161_v16 = vadd.f32 %v3365_v13, %v160_v15 }
  0xdf   :  { %v278_v17 = vpop.f32.mrb[0].mxu1 }
  0xe0   :  { %v282_v18 = vadd.f32 %v278_v17, %v161_v16  ;;  %v2687_v19 = vpop.f32.mrb[1].mxu1 }
  0xe1   :  { %v3450_v51 = vpop.f32.mrb[2].mxu0 }
  0xe2   :  { %3112 = vtanh.f32 %v282_v18  ;;  %v2486_v21 = vmul.f32 -1.442695, %v282_v18  ;;  %v3452_v52 = vpop.f32.mrb[3].mxu0 }
  0xe4   :  { %3114 = vpow2.f32 %v2486_v21 }
  0xe5   :  { %v3454_v53 = vpop.f32.mrb[4].mxu0 }
  0xe6   :  { %v3456_v54 = vpop.f32.mrb[5].mxu0 }
  0xe7   :  { %v373_v55 = vpop.f32.mrb[2].mxu1 }
  0xe8   :  { %v2698_v57 = vpop.f32.mrb[3].mxu1 }
  0xe9   :  { %v3458_v56 = vpop.f32.mrb[6].mxu0 }
  0xea   :  { %v3460_v58 = vpop.f32.mrb[7].mxu0 }
  0xec   :  { %v3113_v20 = vpop.eup %3112 }
  0xed   :  { %292 = vrot.lane.b32.xlu0 %v3113_v20, %s3268_s25 }
  0xee   :  { %v3115_v22 = vpop.eup %3114 }
  0xef   :  { %v286_v23 = vadd.f32 1.0, %v3115_v22 }
  0xf1   :  { %3116 = vrcp.f32 %v286_v23 }
  0xfb   :  { %v3117_v24 = vpop.eup %3116 }
  0xfc   :  { %v290_v27 = vmul.f32 0.0, %v3117_v24 }
 0x15f   :  { %v293_v25 = vpop.permute.xlu0 %292 }
 0x160   :  { %v295_v26 = vmul.f32 %v3117_v24, %v293_v25 }
 0x162   :  { %297 = vrot.lane.b32.xlu0 %v295_v26, %s3268_s25 }
 0x1d4   :  { %v298_v28 = vpop.permute.xlu0 %297 }
 0x1d5   :  { %v3372_v29 = vadd.f32 %v298_v28, %v290_v27 }
 0x1d7   :  { %3118 = vtanh.f32 %v3372_v29 }
 0x1e1   :  { %v3119_v48 = vpop.eup %3118 }
 0x1e2   :  { %303 = vrot.lane.b32.xlu1 %v3119_v48, %s3268_s25  ;;  %v171_v48 = vadd.f32 %v3365_v13, %v3452_v52 }
 0x254   :  { %v304_v49 = vpop.permute.xlu1 %303 }
 0x255   :  { %v306_v50 = vmul.f32 %v3117_v24, %v304_v49 }
 0x257   :  { %378 = vrot.lane.b32.xlu1 %v306_v50, %s3269_s0 }
 0x2c9   :  { %v379_v59 = vpop.permute.xlu1 %378 }
 0x2ca   :  { %2708 = vmatmul.mubr.msk.f32.vlgmr.msra.gmra.mrb[8].mxu0 %vm208_vm2, %v379_v59  ;;  %2719 = vmatmul.mubr.msk.f32.vlgmr.msra.gmra.mrb[4].mxu1 %vm208_vm2, %v379_v59 }
 0x2cb   :  { %2988 = vmatpush3.bf16.msra.mxu1 %v3384_v33  ;;  %2982 = vmatpush3.bf16.msra.mxu0 %v3395_v37 }
 0x2cc   :  { %2989 = vmatprep.subr.bf16.mxu1 %v3265_v3  ;;  %2983 = vmatprep.subr.bf16.mxu0 %v3265_v3 }
 0x2cd   :  { %2740 = vmatprep.mubr.msk.f32.mxu1 %vm3266_vm1, %v3267_v10  ;;  %2729 = vmatprep.mubr.msk.f32.mxu0 %vm3266_vm1, %v3267_v10 }
 0x2cf   :  { %2991 = vmatpush3.bf16.msra.mxu1 %v3418_v44  ;;  %2985 = vmatpush3.bf16.msra.mxu0 %v3416_v43 }
 0x2d0   :  { %2992 = vmatprep.subr.bf16.mxu0 %v3265_v3  ;;  %2998 = vmatprep.subr.bf16.mxu1 %v3265_v3 }
 0x39d   :  { %v448_v62 = vpop.f32.mrb[8].mxu0  ;;  %v544_v63 = vpop.f32.mrb[4].mxu1 }
 0x39e   :  { %v449_v0 = vadd.f32 %v448_v62, %v373_v55  ;;  %v548_v1 = vadd.f32 %v544_v63, %v166_v60  ;;  %v2709_v2 = vpop.f32.mrb[9].mxu0  ;;  %v2720_v4 = vpop.f32.mrb[5].mxu1 }
 0x3a0   :  { %v452_v5 = vadd.f32 %v3481_v61, %v449_v0  ;;  %3120 = vtanh.f32 %v548_v1  ;;  %v2490_v9 = vmul.f32 -1.442695, %v548_v1 }
 0x3a2   :  { %3122 = vtanh.f32 %v452_v5  ;;  %v2488_v11 = vmul.f32 -1.442695, %v452_v5 }
 0x3a3   :  { %3124 = vpow2.f32 %v2490_v9 }
 0x3a4   :  { %3126 = vpow2.f32 %v2488_v11 }
 0x3aa   :  { %v3121_v6 = vpop.eup %3120 }
 0x3ab   :  { %558 = vrot.lane.b32.xlu1 %v3121_v6, %s3268_s25 }
 0x3ac   :  { %v3123_v8 = vpop.eup %3122 }
 0x3ad   :  { %462 = vrot.lane.b32.xlu0 %v3123_v8, %s3268_s25  ;;  %v3125_v14 = vpop.eup %3124 }
 0x3ae   :  { %v3127_v15 = vpop.eup %3126  ;;  %v552_v16 = vadd.f32 1.0, %v3125_v14 }
 0x3af   :  { %v456_v17 = vadd.f32 1.0, %v3127_v15 }
 0x3b0   :  { %3128 = vrcp.f32 %v552_v16 }
 0x3b1   :  { %3130 = vrcp.f32 %v456_v17 }
 0x3ba   :  { %v3129_v18 = vpop.eup %3128 }
 0x3bb   :  { %v3131_v21 = vpop.eup %3130  ;;  %v556_v24 = vmul.f32 %v3129_v18, %v3372_v29 }
 0x3bc   :  { %v460_v27 = vmul.f32 0.0, %v3131_v21 }
 0x41d   :  { %v559_v19 = vpop.permute.xlu1 %558 }
 0x41e   :  { %v561_v20 = vmul.f32 %v3129_v18, %v559_v19 }
 0x41f   :  { %v463_v22 = vpop.permute.xlu0 %462 }
 0x420   :  { %v465_v23 = vmul.f32 %v3131_v21, %v463_v22  ;;  %563 = vrot.lane.b32.xlu1 %v561_v20, %s3268_s25 }
 0x422   :  { %467 = vrot.lane.b32.xlu0 %v465_v23, %s3268_s25 }
 0x492   :  { %v564_v25 = vpop.permute.xlu1 %563 }
 0x493   :  { %v3489_v26 = vadd.f32 %v564_v25, %v556_v24 }
 0x494   :  { %v468_v28 = vpop.permute.xlu0 %467 }
 0x495   :  { %3132 = vtanh.f32 %v3489_v26  ;;  %v3492_v30 = vadd.f32 %v468_v28, %v460_v27 }
 0x497   :  { %3134 = vtanh.f32 %v3492_v30 }
 0x49f   :  { %v3133_v31 = vpop.eup %3132 }
 0x4a0   :  { %569 = vrot.lane.b32.xlu1 %v3133_v31, %s3268_s25  ;;  %v176_v31 = vadd.f32 %v3450_v51, %v3365_v13 }
 0x4a1   :  { %v3135_v32 = vpop.eup %3134 }
 0x4a2   :  { %473 = vrot.lane.b32.xlu0 %v3135_v32, %s3268_s25 }
 0x512   :  { %v570_v34 = vpop.permute.xlu1 %569 }
 0x513   :  { %v572_v35 = vmul.f32 %v3129_v18, %v570_v34 }
 0x514   :  { %v474_v29 = vpop.permute.xlu0 %473 }
 0x515   :  { %v476_v36 = vmul.f32 %v3131_v21, %v474_v29  ;;  %649 = vrot.lane.b32.xlu1 %v572_v35, %s3269_s0 }
 0x517   :  { %574 = vrot.lane.b32.xlu0 %v476_v36, %s3269_s0 }
 0x587   :  { %v650_v38 = vpop.permute.xlu1 %649 }
 0x588   :  { %2741 = vmatmul.mubr.msk.f32.vlgmr.msra.gmra.mrb[6].mxu1 %vm208_vm2, %v650_v38 }
 0x589   :  { %v575_v39 = vpop.permute.xlu0 %574  ;;  %3000 = vmatpush3.bf16.msra.mxu1 %v3395_v37  ;;  %2762 = vmatprep.mubr.msk.f32.mxu1 %vm3266_vm1, %v3267_v10 }
 0x58a   :  { %2730 = vmatmul.mubr.msk.f32.vlgmr.msra.gmra.mrb[10].mxu0 %vm208_vm2, %v575_v39  ;;  %3001 = vmatprep.subr.bf16.mxu1 %v3265_v3 }
 0x58b   :  { %2994 = vmatpush3.bf16.msra.mxu0 %v3337_v7  ;;  %2751 = vmatprep.mubr.msk.f32.mxu0 %vm3266_vm1, %v3267_v10 }
 0x58c   :  { %2995 = vmatprep.subr.bf16.mxu0 %v3265_v3 }
 0x58d   :  { %3003 = vmatpush3.bf16.msra.mxu1 %v3416_v43 }
 0x58e   :  { %3010 = vmatprep.subr.bf16.mxu1 %v3265_v3 }
 0x58f   :  { %2997 = vmatpush3.bf16.msra.mxu0 %v3352_v12 }
 0x590   :  { %3004 = vmatprep.subr.bf16.mxu0 %v3265_v3 }
 0x592   :  { %2752 = vmatmul.mubr.msk.f32.vlgmr.msra.gmra.mrb[12].mxu0 %vm208_vm2, %v650_v38 }
 0x593   :  { %3006 = vmatpush3.bf16.msra.mxu0 %v3384_v33  ;;  %2773 = vmatprep.mubr.msk.f32.mxu0 %vm3266_vm1, %v3267_v10 }
 0x594   :  { %3007 = vmatprep.subr.bf16.mxu0 %v3265_v3 }
 0x597   :  { %3009 = vmatpush3.bf16.msra.mxu0 %v3418_v44 }
 0x598   :  { %3016 = vmatprep.subr.bf16.mxu0 %v3265_v3 }
 0x65b   :  { %v719_v40 = vpop.f32.mrb[6].mxu1 }
 0x65c   :  { %v2742_v41 = vpop.f32.mrb[7].mxu1 }
 0x65d   :  { %v644_v42 = vpop.f32.mrb[10].mxu0 }
 0x65e   :  { %v720_v45 = vadd.f32 %v719_v40, %v644_v42  ;;  %v2731_v46 = vpop.f32.mrb[11].mxu0 }
 0x660   :  { %v723_v47 = vadd.f32 %v3481_v61, %v720_v45 }
 0x662   :  { %3136 = vtanh.f32 %v723_v47  ;;  %v2493_v60 = vmul.f32 -1.442695, %v723_v47 }
 0x665   :  { %v815_v49 = vpop.f32.mrb[12].mxu0 }
 0x666   :  { %v819_v50 = vadd.f32 %v815_v49, %v171_v48  ;;  %v2753_v55 = vpop.f32.mrb[13].mxu0 }
 0x668   :  { %3138 = vtanh.f32 %v819_v50  ;;  %v2495_v62 = vmul.f32 -1.442695, %v819_v50 }
 0x669   :  { %3140 = vpow2.f32 %v2493_v60 }
 0x66a   :  { %3142 = vpow2.f32 %v2495_v62 }
 0x66c   :  { %v3137_v57 = vpop.eup %3136 }
 0x66d   :  { %733 = vrot.lane.b32.xlu0 %v3137_v57, %s3268_s25 }
 0x672   :  { %v3139_v59 = vpop.eup %3138 }
 0x673   :  { %829 = vrot.lane.b32.xlu1 %v3139_v59, %s3268_s25  ;;  %v3141_v63 = vpop.eup %3140 }
 0x674   :  { %v727_v0 = vadd.f32 1.0, %v3141_v63  ;;  %v3143_v1 = vpop.eup %3142 }
 0x675   :  { %v823_v2 = vadd.f32 1.0, %v3143_v1 }
 0x676   :  { %3144 = vrcp.f32 %v727_v0 }
 0x677   :  { %3146 = vrcp.f32 %v823_v2 }
 0x680   :  { %v3145_v52 = vpop.eup %3144 }
 0x681   :  { %v3147_v6 = vpop.eup %3146  ;;  %v731_v11 = vmul.f32 %v3145_v52, %v3492_v30 }
 0x682   :  { %v827_v16 = vmul.f32 %v3147_v6, %v3489_v26 }
 0x6df   :  { %v734_v4 = vpop.permute.xlu0 %733 }
 0x6e0   :  { %v736_v5 = vmul.f32 %v3145_v52, %v734_v4 }
 0x6e2   :  { %738 = vrot.lane.b32.xlu0 %v736_v5, %s3268_s25 }
 0x6e5   :  { %v830_v8 = vpop.permute.xlu1 %829 }
 0x6e6   :  { %v832_v9 = vmul.f32 %v3147_v6, %v830_v8 }
 0x6e8   :  { %834 = vrot.lane.b32.xlu1 %v832_v9, %s3268_s25 }
 0x754   :  { %v739_v14 = vpop.permute.xlu0 %738 }
 0x755   :  { %v3528_v15 = vadd.f32 %v739_v14, %v731_v11 }
 0x757   :  { %3148 = vtanh.f32 %v3528_v15 }
 0x75a   :  { %v835_v17 = vpop.permute.xlu1 %834 }
 0x75b   :  { %v3532_v18 = vadd.f32 %v835_v17, %v827_v16 }
 0x75d   :  { %3150 = vtanh.f32 %v3532_v18 }
 0x761   :  { %v3149_v19 = vpop.eup %3148 }
 0x762   :  { %744 = vrot.lane.b32.xlu0 %v3149_v19, %s3268_s25 }
 0x767   :  { %v3151_v20 = vpop.eup %3150 }
 0x768   :  { %840 = vrot.lane.b32.xlu1 %v3151_v20, %s3268_s25 }
 0x7d4   :  { %v745_v21 = vpop.permute.xlu0 %744 }
 0x7d5   :  { %v747_v22 = vmul.f32 %v3145_v52, %v745_v21  ;;  %v181_v21 = vadd.f32 %v3365_v13, %v3456_v54 }
 0x7d7   :  { %845 = vrot.lane.b32.xlu0 %v747_v22, %s3269_s0 }
 0x7da   :  { %v841_v23 = vpop.permute.xlu1 %840 }
 0x7db   :  { %v843_v24 = vmul.f32 %v3147_v6, %v841_v23 }
 0x7dd   :  { %920 = vrot.lane.b32.xlu1 %v843_v24, %s3269_s0 }
 0x849   :  { %v846_v25 = vpop.permute.xlu0 %845 }
 0x84a   :  { %2763 = vmatmul.mubr.msk.f32.vlgmr.msra.gmra.mrb[8].mxu1 %vm208_vm2, %v846_v25 }
 0x84b   :  { %3012 = vmatpush3.bf16.msra.mxu1 %v3337_v7  ;;  %2784 = vmatprep.mubr.msk.f32.mxu1 %vm3266_vm1, %v3267_v10 }
 0x84c   :  { %3013 = vmatprep.subr.bf16.mxu1 %v3265_v3 }
 0x84f   :  { %v921_v26 = vpop.permute.xlu1 %920  ;;  %3015 = vmatpush3.bf16.msra.mxu1 %v3352_v12 }
 0x850   :  { %2774 = vmatmul.mubr.msk.f32.vlgmr.msra.gmra.mrb[14].mxu0 %vm208_vm2, %v921_v26  ;;  %3022 = vmatprep.subr.bf16.mxu1 %v3265_v3 }
 0x851   :  { %3018 = vmatpush3.bf16.msra.mxu0 %v3395_v37  ;;  %2795 = vmatprep.mubr.msk.f32.mxu0 %vm3266_vm1, %v3267_v10 }
 0x852   :  { %2785 = vmatmul.mubr.msk.f32.vlgmr.msra.gmra.mrb[10].mxu1 %vm208_vm2, %v921_v26  ;;  %3019 = vmatprep.subr.bf16.mxu0 %v3265_v3 }
 0x853   :  { %3024 = vmatpush3.bf16.msra.mxu1 %v3384_v33  ;;  %2806 = vmatprep.mubr.msk.f32.mxu1 %vm3266_vm1, %v3267_v10 }
 0x854   :  { %3025 = vmatprep.subr.bf16.mxu1 %v3265_v3 }
 0x855   :  { %3021 = vmatpush3.bf16.msra.mxu0 %v3416_v43 }
 0x856   :  { %3028 = vmatprep.subr.bf16.mxu0 %v3265_v3 }
 0x857   :  { %3027 = vmatpush3.bf16.msra.mxu1 %v3418_v44 }
 0x858   :  { %3034 = vmatprep.subr.bf16.mxu1 %v3265_v3 }
 0x91d   :  { %v915_v27 = vpop.f32.mrb[8].mxu1 }
 0x91e   :  { %v2764_v28 = vpop.f32.mrb[9].mxu1 }
 0x923   :  { %v990_v30 = vpop.f32.mrb[14].mxu0 }
 0x924   :  { %v991_v32 = vadd.f32 %v990_v30, %v915_v27  ;;  %v2775_v34 = vpop.f32.mrb[15].mxu0 }
 0x925   :  { %v1086_v35 = vpop.f32.mrb[10].mxu1 }
 0x926   :  { %v994_v29 = vadd.f32 %v3481_v61, %v991_v32  ;;  %v1090_v36 = vadd.f32 %v1086_v35, %v176_v31  ;;  %v2786_v38 = vpop.f32.mrb[11].mxu1 }
 0x928   :  { %3152 = vtanh.f32 %v994_v29  ;;  %v2498_v41 = vmul.f32 -1.442695, %v994_v29  ;;  %v2500_v42 = vmul.f32 -1.442695, %v1090_v36 }
 0x929   :  { %3154 = vtanh.f32 %v1090_v36 }
 0x92a   :  { %3156 = vpow2.f32 %v2498_v41 }
 0x92b   :  { %3158 = vpow2.f32 %v2500_v42 }
 0x932   :  { %v3153_v39 = vpop.eup %3152 }
 0x933   :  { %v3155_v40 = vpop.eup %3154  ;;  %1004 = vrot.lane.b32.xlu0 %v3153_v39, %s3268_s25 }
 0x934   :  { %1100 = vrot.lane.b32.xlu1 %v3155_v40, %s3268_s25  ;;  %v3157_v51 = vpop.eup %3156 }
 0x935   :  { %v3159_v45 = vpop.eup %3158  ;;  %v998_v46 = vadd.f32 1.0, %v3157_v51 }
 0x936   :  { %v1094_v47 = vadd.f32 1.0, %v3159_v45 }
 0x937   :  { %3160 = vrcp.f32 %v998_v46 }
 0x938   :  { %3162 = vrcp.f32 %v1094_v47 }
 0x941   :  { %v3161_v48 = vpop.eup %3160 }
 0x942   :  { %v3163_v50 = vpop.eup %3162  ;;  %v1002_v60 = vmul.f32 %v3161_v48, %v3528_v15 }
 0x943   :  { %v1098_v63 = vmul.f32 %v3163_v50, %v3532_v18 }
 0x9a5   :  { %v1005_v49 = vpop.permute.xlu0 %1004 }
 0x9a6   :  { %v1007_v55 = vmul.f32 %v3161_v48, %v1005_v49  ;;  %v1101_v57 = vpop.permute.xlu1 %1100 }
 0x9a7   :  { %v1103_v59 = vmul.f32 %v3163_v50, %v1101_v57 }
 0x9a8   :  { %1009 = vrot.lane.b32.xlu0 %v1007_v55, %s3268_s25 }
 0x9a9   :  { %1105 = vrot.lane.b32.xlu1 %v1103_v59, %s3268_s25 }
 0xa1a   :  { %v1010_v62 = vpop.permute.xlu0 %1009 }
 0xa1b   :  { %v3569_v0 = vadd.f32 %v1010_v62, %v1002_v60  ;;  %v1106_v1 = vpop.permute.xlu1 %1105 }
 0xa1c   :  { %v3571_v2 = vadd.f32 %v1106_v1, %v1098_v63 }
 0xa1d   :  { %3164 = vtanh.f32 %v3569_v0 }
 0xa1e   :  { %3166 = vtanh.f32 %v3571_v2 }
 0xa27   :  { %v3165_v52 = vpop.eup %3164 }
 0xa28   :  { %v3167_v4 = vpop.eup %3166  ;;  %1015 = vrot.lane.b32.xlu0 %v3165_v52, %s3268_s25  ;;  %v186_v52 = vadd.f32 %v3454_v53, %v3365_v13 }
 0xa29   :  { %1111 = vrot.lane.b32.xlu1 %v3167_v4, %s3268_s25 }
 0xa9a   :  { %v1016_v5 = vpop.permute.xlu0 %1015 }
 0xa9b   :  { %v1018_v6 = vmul.f32 %v3161_v48, %v1016_v5  ;;  %v1112_v8 = vpop.permute.xlu1 %1111 }
 0xa9c   :  { %v1114_v9 = vmul.f32 %v3163_v50, %v1112_v8 }
 0xa9d   :  { %1116 = vrot.lane.b32.xlu0 %v1018_v6, %s3269_s0 }
 0xa9e   :  { %1191 = vrot.lane.b32.xlu1 %v1114_v9, %s3269_s0 }
 0xb0f   :  { %v1117_v11 = vpop.permute.xlu0 %1116 }
 0xb10   :  { %v1192_v14 = vpop.permute.xlu1 %1191  ;;  %2796 = vmatmul.mubr.msk.f32.vlgmr.msra.gmra.mrb[16].mxu0 %vm208_vm2, %v1117_v11 }
 0xb11   :  { %2807 = vmatmul.mubr.msk.f32.vlgmr.msra.gmra.mrb[12].mxu1 %vm208_vm2, %v1192_v14  ;;  %3030 = vmatpush3.bf16.msra.mxu0 %v3337_v7 }
 0xb12   :  { %3031 = vmatprep.subr.bf16.mxu0 %v3265_v3  ;;  %2817 = vmatprep.mubr.msk.f32.mxu0 %vm3266_vm1, %v3267_v10 }
 0xb13   :  { %3036 = vmatpush3.bf16.msra.mxu1 %v3395_v37  ;;  %2828 = vmatprep.mubr.msk.f32.mxu1 %vm3266_vm1, %v3267_v10 }
 0xb14   :  { %3037 = vmatprep.subr.bf16.mxu1 %v3265_v3 }
 0xb15   :  { %3033 = vmatpush3.bf16.msra.mxu0 %v3352_v12 }
 0xb16   :  { %3040 = vmatprep.subr.bf16.mxu0 %v3265_v3 }
 0xb17   :  { %3039 = vmatpush3.bf16.msra.mxu1 %v3416_v43 }
 0xb18   :  { %2818 = vmatmul.mubr.msk.f32.vlgmr.msra.gmra.mrb[18].mxu0 %vm208_vm2, %v1192_v14  ;;  %3046 = vmatprep.subr.bf16.mxu1 %v3265_v3 }
 0xb19   :  { %3042 = vmatpush3.bf16.msra.mxu0 %v3384_v33  ;;  %2839 = vmatprep.mubr.msk.f32.mxu0 %vm3266_vm1, %v3267_v10 }
 0xb1a   :  { %3043 = vmatprep.subr.bf16.mxu0 %v3265_v3 }
 0xb1d   :  { %3045 = vmatpush3.bf16.msra.mxu0 %v3418_v44 }
 0xb1e   :  { %3052 = vmatprep.subr.bf16.mxu0 %v3265_v3 }
 0xbe3   :  { %v1186_v15 = vpop.f32.mrb[16].mxu0 }
 0xbe4   :  { %v1261_v16 = vpop.f32.mrb[12].mxu1  ;;  %v2797_v17 = vpop.f32.mrb[17].mxu0 }
 0xbe5   :  { %v1262_v18 = vadd.f32 %v1261_v16, %v1186_v15  ;;  %v2808_v19 = vpop.f32.mrb[13].mxu1 }
 0xbe7   :  { %v1265_v20 = vadd.f32 %v3481_v61, %v1262_v18 }
 0xbe9   :  { %3168 = vtanh.f32 %v1265_v20  ;;  %v2503_v27 = vmul.f32 -1.442695, %v1265_v20 }
 0xbeb   :  { %v1357_v22 = vpop.f32.mrb[18].mxu0 }
 0xbec   :  { %v1361_v23 = vadd.f32 %v1357_v22, %v181_v21  ;;  %v2819_v24 = vpop.f32.mrb[19].mxu0 }
 0xbee   :  { %3170 = vtanh.f32 %v1361_v23  ;;  %v2505_v28 = vmul.f32 -1.442695, %v1361_v23 }
 0xbef   :  { %3172 = vpow2.f32 %v2503_v27 }
 0xbf0   :  { %3174 = vpow2.f32 %v2505_v28 }
 0xbf3   :  { %v3169_v25 = vpop.eup %3168 }
 0xbf4   :  { %1275 = vrot.lane.b32.xlu0 %v3169_v25, %s3268_s25 }
 0xbf8   :  { %v3171_v26 = vpop.eup %3170 }
 0xbf9   :  { %1371 = vrot.lane.b32.xlu1 %v3171_v26, %s3268_s25  ;;  %v3173_v30 = vpop.eup %3172 }
 0xbfa   :  { %v1269_v31 = vadd.f32 1.0, %v3173_v30  ;;  %v3175_v32 = vpop.eup %3174 }
 0xbfb   :  { %v1365_v34 = vadd.f32 1.0, %v3175_v32 }
 0xbfc   :  { %3176 = vrcp.f32 %v1269_v31 }
 0xbfd   :  { %3178 = vrcp.f32 %v1365_v34 }
 0xc06   :  { %v3177_v54 = vpop.eup %3176 }
 0xc07   :  { %v3179_v36 = vpop.eup %3178  ;;  %v1273_v40 = vmul.f32 %v3177_v54, %v3569_v0 }
 0xc08   :  { %v1369_v51 = vmul.f32 %v3179_v36, %v3571_v2 }
 0xc66   :  { %v1276_v35 = vpop.permute.xlu0 %1275 }
 0xc67   :  { %v1278_v29 = vmul.f32 %v3177_v54, %v1276_v35 }
 0xc69   :  { %1280 = vrot.lane.b32.xlu0 %v1278_v29, %s3268_s25 }
 0xc6b   :  { %v1372_v38 = vpop.permute.xlu1 %1371 }
 0xc6c   :  { %v1374_v39 = vmul.f32 %v3179_v36, %v1372_v38 }
 0xc6e   :  { %1376 = vrot.lane.b32.xlu1 %v1374_v39, %s3268_s25 }
 0xcdb   :  { %v1281_v41 = vpop.permute.xlu0 %1280 }
 0xcdc   :  { %v3608_v42 = vadd.f32 %v1281_v41, %v1273_v40 }
 0xcde   :  { %3180 = vtanh.f32 %v3608_v42 }
 0xce0   :  { %v1377_v45 = vpop.permute.xlu1 %1376 }
 0xce1   :  { %v3612_v46 = vadd.f32 %v1377_v45, %v1369_v51 }
 0xce3   :  { %3182 = vtanh.f32 %v3612_v46 }
 0xce8   :  { %v3181_v47 = vpop.eup %3180 }
 0xce9   :  { %1286 = vrot.lane.b32.xlu0 %v3181_v47, %s3268_s25  ;;  %v191_v47 = vadd.f32 %v3365_v13, %v3460_v58 }
 0xced   :  { %v3183_v48 = vpop.eup %3182 }
 0xcee   :  { %1382 = vrot.lane.b32.xlu1 %v3183_v48, %s3268_s25 }
 0xd5b   :  { %v1287_v49 = vpop.permute.xlu0 %1286 }
 0xd5c   :  { %v1289_v50 = vmul.f32 %v3177_v54, %v1287_v49 }
 0xd5e   :  { %1387 = vrot.lane.b32.xlu0 %v1289_v50, %s3269_s0 }
 0xd60   :  { %v1383_v55 = vpop.permute.xlu1 %1382 }
 0xd61   :  { %v1385_v57 = vmul.f32 %v3179_v36, %v1383_v55 }
 0xd63   :  { %1462 = vrot.lane.b32.xlu1 %v1385_v57, %s3269_s0 }
 0xdd0   :  { %v1388_v59 = vpop.permute.xlu0 %1387 }
 0xdd1   :  { %2829 = vmatmul.mubr.msk.f32.vlgmr.msra.gmra.mrb[14].mxu1 %vm208_vm2, %v1388_v59 }
 0xdd2   :  { %3048 = vmatpush3.bf16.msra.mxu1 %v3337_v7  ;;  %2850 = vmatprep.mubr.msk.f32.mxu1 %vm3266_vm1, %v3267_v10 }
 0xdd3   :  { %3049 = vmatprep.subr.bf16.mxu1 %v3265_v3 }
 0xdd5   :  { %v1463_v60 = vpop.permute.xlu1 %1462 }
 0xdd6   :  { %3051 = vmatpush3.bf16.msra.mxu1 %v3352_v12  ;;  %2840 = vmatmul.mubr.msk.f32.vlgmr.msra.gmra.mrb[20].mxu0 %vm208_vm2, %v1463_v60 }
 0xdd7   :  { %3054 = vmatpush3.bf16.msra.mxu0 %v3395_v37  ;;  %3058 = vmatprep.subr.bf16.mxu1 %v3265_v3 }
 0xdd8   :  { %3055 = vmatprep.subr.bf16.mxu0 %v3265_v3  ;;  %2861 = vmatprep.mubr.msk.f32.mxu0 %vm3266_vm1, %v3267_v10 }
 0xdd9   :  { %2851 = vmatmul.mubr.msk.f32.vlgmr.msra.gmra.mrb[16].mxu1 %vm208_vm2, %v1463_v60 }
 0xdda   :  { %3060 = vmatpush3.bf16.msra.mxu1 %v3384_v33  ;;  %2872 = vmatprep.mubr.msk.f32.mxu1 %vm3266_vm1, %v3267_v10 }
 0xddb   :  { %3057 = vmatpush3.bf16.msra.mxu0 %v3416_v43  ;;  %3061 = vmatprep.subr.bf16.mxu1 %v3265_v3 }
 0xddc   :  { %3064 = vmatprep.subr.bf16.mxu0 %v3265_v3 }
 0xdde   :  { %3063 = vmatpush3.bf16.msra.mxu1 %v3418_v44 }
 0xddf   :  { %3070 = vmatprep.subr.bf16.mxu1 %v3265_v3 }
 0xea4   :  { %v1457_v62 = vpop.f32.mrb[14].mxu1 }
 0xea5   :  { %v2830_v63 = vpop.f32.mrb[15].mxu1 }
 0xea9   :  { %v1532_v0 = vpop.f32.mrb[20].mxu0 }
 0xeaa   :  { %v1533_v1 = vadd.f32 %v1532_v0, %v1457_v62  ;;  %v2841_v2 = vpop.f32.mrb[21].mxu0 }
 0xeac   :  { %v1536_v4 = vadd.f32 %v3481_v61, %v1533_v1  ;;  %v1628_v5 = vpop.f32.mrb[16].mxu1 }
 0xead   :  { %v1632_v6 = vadd.f32 %v1628_v5, %v186_v52  ;;  %v2852_v8 = vpop.f32.mrb[17].mxu1 }
 0xeae   :  { %3184 = vtanh.f32 %v1536_v4  ;;  %v2508_v14 = vmul.f32 -1.442695, %v1536_v4 }
 0xeaf   :  { %3186 = vtanh.f32 %v1632_v6  ;;  %v2510_v15 = vmul.f32 -1.442695, %v1632_v6 }
 0xeb0   :  { %3188 = vpow2.f32 %v2508_v14 }
 0xeb1   :  { %3190 = vpow2.f32 %v2510_v15 }
 0xeb8   :  { %v3185_v9 = vpop.eup %3184 }
 0xeb9   :  { %v3187_v11 = vpop.eup %3186  ;;  %1546 = vrot.lane.b32.xlu0 %v3185_v9, %s3268_s25 }
 0xeba   :  { %1642 = vrot.lane.b32.xlu1 %v3187_v11, %s3268_s25  ;;  %v3189_v16 = vpop.eup %3188 }
 0xebb   :  { %v3191_v17 = vpop.eup %3190  ;;  %v1540_v53 = vadd.f32 1.0, %v3189_v16 }
 0xebc   :  { %v1636_v18 = vadd.f32 1.0, %v3191_v17 }
 0xebd   :  { %3192 = vrcp.f32 %v1540_v53 }
 0xebe   :  { %3194 = vrcp.f32 %v1636_v18 }
 0xec7   :  { %v3193_v19 = vpop.eup %3192 }
 0xec8   :  { %v3195_v21 = vpop.eup %3194  ;;  %v1544_v25 = vmul.f32 %v3193_v19, %v3608_v42 }
 0xec9   :  { %v1640_v27 = vmul.f32 %v3195_v21, %v3612_v46 }
 0xf2b   :  { %v1547_v20 = vpop.permute.xlu0 %1546 }
 0xf2c   :  { %v1549_v22 = vmul.f32 %v3193_v19, %v1547_v20  ;;  %v1643_v23 = vpop.permute.xlu1 %1642 }
 0xf2d   :  { %v1645_v24 = vmul.f32 %v3195_v21, %v1643_v23 }
 0xf2e   :  { %1551 = vrot.lane.b32.xlu0 %v1549_v22, %s3268_s25 }
 0xf2f   :  { %1647 = vrot.lane.b32.xlu1 %v1645_v24, %s3268_s25 }
 0xfa0   :  { %v1552_v26 = vpop.permute.xlu0 %1551 }
 0xfa1   :  { %v3649_v28 = vadd.f32 %v1552_v26, %v1544_v25  ;;  %v1648_v30 = vpop.permute.xlu1 %1647 }
 0xfa2   :  { %v3651_v31 = vadd.f32 %v1648_v30, %v1640_v27 }
 0xfa3   :  { %3196 = vtanh.f32 %v3649_v28 }
 0xfa4   :  { %3198 = vtanh.f32 %v3651_v31 }
 0xfad   :  { %v3197_v32 = vpop.eup %3196 }
 0xfae   :  { %v3199_v34 = vpop.eup %3198  ;;  %1557 = vrot.lane.b32.xlu0 %v3197_v32, %s3268_s25 }
 0xfaf   :  { %1653 = vrot.lane.b32.xlu1 %v3199_v34, %s3268_s25 }
0x1020   :  { %v1558_v54 = vpop.permute.xlu0 %1557 }
0x1021   :  { %v1560_v35 = vmul.f32 %v3193_v19, %v1558_v54  ;;  %v1654_v29 = vpop.permute.xlu1 %1653 }
0x1022   :  { %v1656_v36 = vmul.f32 %v3195_v21, %v1654_v29 }
0x1023   :  { %1658 = vrot.lane.b32.xlu0 %v1560_v35, %s3269_s0 }
0x1024   :  { %1733 = vrot.lane.b32.xlu1 %v1656_v36, %s3269_s0 }
0x1095   :  { %v1659_v38 = vpop.permute.xlu0 %1658 }
0x1096   :  { %v1734_v39 = vpop.permute.xlu1 %1733  ;;  %2862 = vmatmul.mubr.msk.f32.vlgmr.msra.gmra.mrb[22].mxu0 %vm208_vm2, %v1659_v38 }
0x1097   :  { %2873 = vmatmul.mubr.msk.f32.vlgmr.msra.gmra.mrb[18].mxu1 %vm208_vm2, %v1734_v39  ;;  %3066 = vmatpush3.bf16.msra.mxu0 %v3337_v7 }
0x1098   :  { %3067 = vmatprep.subr.bf16.mxu0 %v3265_v3  ;;  %2883 = vmatprep.mubr.msk.f32.mxu0 %vm3266_vm1, %v3267_v10 }
0x1099   :  { %3072 = vmatpush3.bf16.msra.mxu1 %v3395_v37  ;;  %2894 = vmatprep.mubr.msk.f32.mxu1 %vm3266_vm1, %v3267_v10 }
0x109a   :  { %3073 = vmatprep.subr.bf16.mxu1 %v3265_v3 }
0x109b   :  { %3069 = vmatpush3.bf16.msra.mxu0 %v3352_v12 }
0x109c   :  { %3076 = vmatprep.subr.bf16.mxu0 %v3265_v3 }
0x109d   :  { %3075 = vmatpush3.bf16.msra.mxu1 %v3416_v43 }
0x109e   :  { %2884 = vmatmul.mubr.msk.f32.vlgmr.msra.gmra.mrb[24].mxu0 %vm208_vm2, %v1734_v39  ;;  %3082 = vmatprep.subr.bf16.mxu1 %v3265_v3 }
0x109f   :  { %3078 = vmatpush3.bf16.msra.mxu0 %v3384_v33  ;;  %2905 = vmatprep.mubr.msk.f32.mxu0 %vm3266_vm1, %v3267_v10 }
0x10a0   :  { %3079 = vmatprep.subr.bf16.mxu0 %v3265_v3 }
0x10a3   :  { %3081 = vmatpush3.bf16.msra.mxu0 %v3418_v44 }
0x10a4   :  { %3088 = vmatprep.subr.bf16.mxu0 %v3265_v3 }
0x1169   :  { %v1728_v40 = vpop.f32.mrb[22].mxu0 }
0x116a   :  { %v1803_v41 = vpop.f32.mrb[18].mxu1  ;;  %v2863_v42 = vpop.f32.mrb[23].mxu0 }
0x116b   :  { %v1804_v51 = vadd.f32 %v1803_v41, %v1728_v40  ;;  %v2874_v45 = vpop.f32.mrb[19].mxu1 }
0x116d   :  { %v1807_v46 = vadd.f32 %v3481_v61, %v1804_v51 }
0x116f   :  { %3200 = vtanh.f32 %v1807_v46  ;;  %v2513_v59 = vmul.f32 -1.442695, %v1807_v46 }
0x1171   :  { %v1899_v48 = vpop.f32.mrb[24].mxu0 }
0x1172   :  { %v1903_v49 = vadd.f32 %v1899_v48, %v191_v47  ;;  %v2885_v50 = vpop.f32.mrb[25].mxu0 }
0x1174   :  { %3202 = vtanh.f32 %v1903_v49  ;;  %v2515_v60 = vmul.f32 -1.442695, %v1903_v49 }
0x1175   :  { %3204 = vpow2.f32 %v2513_v59 }
0x1176   :  { %3206 = vpow2.f32 %v2515_v60 }
0x1179   :  { %v3201_v55 = vpop.eup %3200 }
0x117a   :  { %1817 = vrot.lane.b32.xlu0 %v3201_v55, %s3268_s25 }
0x117e   :  { %v3203_v57 = vpop.eup %3202 }
0x117f   :  { %1913 = vrot.lane.b32.xlu1 %v3203_v57, %s3268_s25  ;;  %v3205_v62 = vpop.eup %3204 }
0x1180   :  { %v1811_v63 = vadd.f32 1.0, %v3205_v62  ;;  %v3207_v0 = vpop.eup %3206 }
0x1181   :  { %v1907_v1 = vadd.f32 1.0, %v3207_v0 }
0x1182   :  { %3208 = vrcp.f32 %v1811_v63 }
0x1183   :  { %3210 = vrcp.f32 %v1907_v1 }
0x118c   :  { %v3209_v13 = vpop.eup %3208 }
0x118d   :  { %v3211_v52 = vpop.eup %3210  ;;  %v1815_v6 = vmul.f32 %v3209_v13, %v3649_v28 }
0x118e   :  { %v1911_v11 = vmul.f32 %v3211_v52, %v3651_v31 }
0x11ec   :  { %v1818_v58 = vpop.permute.xlu0 %1817 }
0x11ed   :  { %v1820_v2 = vmul.f32 %v3209_v13, %v1818_v58 }
0x11ef   :  { %1822 = vrot.lane.b32.xlu0 %v1820_v2, %s3268_s25 }
0x11f1   :  { %v1914_v4 = vpop.permute.xlu1 %1913 }
0x11f2   :  { %v1916_v5 = vmul.f32 %v3211_v52, %v1914_v4 }
0x11f4   :  { %1918 = vrot.lane.b32.xlu1 %v1916_v5, %s3268_s25 }
0x1261   :  { %v1823_v8 = vpop.permute.xlu0 %1822 }
0x1262   :  { %v3688_v9 = vadd.f32 %v1823_v8, %v1815_v6 }
0x1264   :  { %3212 = vtanh.f32 %v3688_v9 }
0x1266   :  { %v1919_v14 = vpop.permute.xlu1 %1918 }
0x1267   :  { %v3692_v15 = vadd.f32 %v1919_v14, %v1911_v11 }
0x1269   :  { %3214 = vtanh.f32 %v3692_v15 }
0x126e   :  { %v3213_v16 = vpop.eup %3212 }
0x126f   :  { %1828 = vrot.lane.b32.xlu0 %v3213_v16, %s3268_s25 }
0x1273   :  { %v3215_v17 = vpop.eup %3214 }
0x1274   :  { %1924 = vrot.lane.b32.xlu1 %v3215_v17, %s3268_s25  ;;  %v2375_v17 = vld [vmem:[%s3779_s7 + $0x8] sm:$0xff] }
0x12e1   :  { %v1829_v53 = vpop.permute.xlu0 %1828 }
0x12e2   :  { %v1831_v18 = vmul.f32 %v3209_v13, %v1829_v53  ;;  %v2376_v53 = vld [vmem:[%s3779_s7 + $0x10] sm:$0xff] }
0x12e4   :  { %1929 = vrot.lane.b32.xlu0 %v1831_v18, %s3269_s0 }
0x12e6   :  { %v1925_v19 = vpop.permute.xlu1 %1924 }
0x12e7   :  { %v1927_v20 = vmul.f32 %v3211_v52, %v1925_v19  ;;  %v2377_v19 = vld [vmem:[%s3779_s7 + $0x18] sm:$0xff] }
0x12e9   :  { %2004 = vrot.lane.b32.xlu1 %v1927_v20, %s3269_s0  ;;  %v3104_v20 = vpack.c.bf16 %v2377_v19, %v2376_v53 }
0x1356   :  { %v1930_v21 = vpop.permute.xlu0 %1929 }
0x1357   :  { %2895 = vmatmul.mubr.msk.f32.vlgmr.msra.gmra.mrb[20].mxu1 %vm208_vm2, %v1930_v21 }
0x1358   :  { %3084 = vmatpush3.bf16.msra.mxu1 %v3337_v7  ;;  %2916 = vmatprep.mubr.msk.f32.mxu1 %vm3266_vm1, %v3267_v10 }
0x1359   :  { %3085 = vmatprep.subr.bf16.mxu1 %v3265_v3 }
0x135b   :  { %v2005_v22 = vpop.permute.xlu1 %2004 }
0x135c   :  { %3087 = vmatpush3.bf16.msra.mxu1 %v3352_v12  ;;  %2906 = vmatmul.mubr.msk.f32.vlgmr.msra.gmra.mrb[26].mxu0 %vm208_vm2, %v2005_v22 }
0x135d   :  { %3094 = vmatprep.subr.bf16.mxu1 %v3265_v3  ;;  %3090 = vmatpush3.bf16.msra.mxu0 %v3395_v37 }
0x135e   :  { %3091 = vmatprep.subr.bf16.mxu0 %v3265_v3  ;;  %2927 = vmatprep.mubr.msk.f32.mxu0 %vm3266_vm1, %v3267_v10 }
0x135f   :  { %2917 = vmatmul.mubr.msk.f32.vlgmr.msra.gmra.mrb[22].mxu1 %vm208_vm2, %v2005_v22 }
0x1360   :  { %3096 = vmatpush3.bf16.msra.mxu1 %v3384_v33  ;;  %2938 = vmatprep.mubr.msk.f32.mxu1 %vm3266_vm1, %v3267_v10  ;;  %v3240_v33 = vld [vmem:[%s3775_s3] ss:$0 sm:$0xff] }
0x1361   :  { %3097 = vmatprep.subr.bf16.mxu1 %v3265_v3  ;;  %3093 = vmatpush3.bf16.msra.mxu0 %v3416_v43  ;;  %v196_v25 = vadd.f32 %v3240_v33, %v3458_v56 }
0x1362   :  { %3100 = vmatprep.subr.bf16.mxu0 %v3265_v3 }
0x1364   :  { %3099 = vmatpush3.bf16.msra.mxu1 %v3418_v44 }
0x142a   :  { %v1999_v7 = vpop.f32.mrb[20].mxu1 }
0x142b   :  { %v2896_v12 = vpop.f32.mrb[21].mxu1 }
0x142f   :  { %v2074_v37 = vpop.f32.mrb[26].mxu0 }
0x1430   :  { %v2075_v23 = vadd.f32 %v2074_v37, %v1999_v7  ;;  %v2907_v24 = vpop.f32.mrb[27].mxu0  ;;  %v2524_v37 = vld [vmem:[%s3780_s8] ss:$0 sm:$0xff] }
0x1432   :  { %v2078_v26 = vadd.f32 %v3481_v61, %v2075_v23  ;;  %v2170_v27 = vpop.f32.mrb[22].mxu1 }
0x1433   :  { %v2174_v28 = vadd.f32 %v2170_v27, %v196_v25  ;;  %v2918_v43 = vpop.f32.mrb[23].mxu1 }
0x1434   :  { %3216 = vtanh.f32 %v2078_v26  ;;  %v2518_v31 = vmul.f32 -1.442695, %v2078_v26 }
0x1435   :  { %3218 = vtanh.f32 %v2174_v28  ;;  %v2520_v32 = vmul.f32 -1.442695, %v2174_v28 }
0x1436   :  { %3220 = vpow2.f32 %v2518_v31 }
0x1437   :  { %3222 = vpow2.f32 %v2520_v32 }
0x143e   :  { %v3217_v30 = vpop.eup %3216 }
0x143f   :  { %v3219_v44 = vpop.eup %3218  ;;  %2088 = vrot.lane.b32.xlu0 %v3217_v30, %s3268_s25 }
0x1440   :  { %2184 = vrot.lane.b32.xlu1 %v3219_v44, %s3268_s25  ;;  %v3221_v34 = vpop.eup %3220 }
0x1441   :  { %v3223_v54 = vpop.eup %3222  ;;  %v2082_v56 = vadd.f32 1.0, %v3221_v34 }
0x1442   :  { %v2178_v35 = vadd.f32 1.0, %v3223_v54 }
0x1443   :  { %3224 = vrcp.f32 %v2082_v56 }
0x1444   :  { %3226 = vrcp.f32 %v2178_v35 }
0x144d   :  { %v3225_v29 = vpop.eup %3224 }
0x144e   :  { %v3227_v38 = vpop.eup %3226  ;;  %v2086_v42 = vmul.f32 %v3225_v29, %v3688_v9 }
0x144f   :  { %v2182_v45 = vmul.f32 %v3227_v38, %v3692_v15 }
0x14b1   :  { %v2089_v36 = vpop.permute.xlu0 %2088 }
0x14b2   :  { %v2091_v39 = vmul.f32 %v3225_v29, %v2089_v36  ;;  %v2185_v40 = vpop.permute.xlu1 %2184 }
0x14b3   :  { %v2187_v41 = vmul.f32 %v3227_v38, %v2185_v40 }
0x14b4   :  { %2093 = vrot.lane.b32.xlu0 %v2091_v39, %s3268_s25 }
0x14b5   :  { %2189 = vrot.lane.b32.xlu1 %v2187_v41, %s3268_s25 }
0x1526   :  { %v2094_v51 = vpop.permute.xlu0 %2093 }
0x1527   :  { %v2096_v46 = vadd.f32 %v2094_v51, %v2086_v42  ;;  %v2190_v47 = vpop.permute.xlu1 %2189 }
0x1528   :  { %v2192_v48 = vadd.f32 %v2190_v47, %v2182_v45 }
0x1529   :  { %3228 = vtanh.f32 %v2096_v46 }
0x152a   :  { %3230 = vtanh.f32 %v2192_v48 }
0x1533   :  { %v3229_v49 = vpop.eup %3228 }
0x1534   :  { %v3231_v50 = vpop.eup %3230  ;;  %2099 = vrot.lane.b32.xlu0 %v3229_v49, %s3268_s25 }
0x1535   :  { %2195 = vrot.lane.b32.xlu1 %v3231_v50, %s3268_s25 }
0x15a6   :  { %v2100_v55 = vpop.permute.xlu0 %2099 }
0x15a7   :  { %v2102_v57 = vmul.f32 %v3225_v29, %v2100_v55  ;;  %v2196_v59 = vpop.permute.xlu1 %2195 }
0x15a8   :  { %v2198_v60 = vmul.f32 %v3227_v38, %v2196_v59 }
0x15a9   :  { %2200 = vrot.lane.b32.xlu0 %v2102_v57, %s3269_s0 }
0x15aa   :  { %2275 = vrot.lane.b32.xlu1 %v2198_v60, %s3269_s0 }
0x161b   :  { %v2201_v62 = vpop.permute.xlu0 %2200 }
0x161c   :  { %v2276_v63 = vpop.permute.xlu1 %2275  ;;  %2928 = vmatmul.mubr.msk.f32.vlgmr.msra.gmra.mrb[28].mxu0 %vm208_vm2, %v2201_v62 }
0x161d   :  { %2939 = vmatmul.mubr.msk.f32.vlgmr.msra.gmra.mrb[24].mxu1 %vm208_vm2, %v2276_v63  ;;  %2949 = vmatprep.mubr.msk.f32.mxu0 %vm3266_vm1, %v3267_v10 }
0x16ef   :  { %v2270_v0 = vpop.f32.mrb[28].mxu0 }
0x16f0   :  { %v2345_v1 = vpop.f32.mrb[24].mxu1  ;;  %v2929_v13 = vpop.f32.mrb[29].mxu0 }
0x16f1   :  { %v2346_v58 = vadd.f32 %v2345_v1, %v2270_v0  ;;  %v2940_v2 = vpop.f32.mrb[25].mxu1 }
0x16f3   :  { %v2349_v52 = vadd.f32 %v3481_v61, %v2346_v58  ;;  %v2374_v61 = vld [vmem:[%s3779_s7] sm:$0xff]  ;;  %s3270_s7 = smov [#allocation3]  }
0x16f4   :  { %v3101_v18 = vpack.c.bf16 %v2375_v17, %v2374_v61  ;;  %s2468_s20 = sshll.u32 %s3270_s7, 4  ;;  %s2469_s20 = int_to_ptr.vmem [resolvable:$true] %s2468_s20 }
0x16f5   :  { %3232 = vtanh.f32 %v2349_v52  ;;  %v2523_v5 = vmul.f32 -1.442695, %v2349_v52  ;;  %p3246_p1 = scmp.lt.s32.totalorder %s2469_s20, %s2469_s20 }
0x16f6   :  { %3102 = vmatpush3.bf16.msra.mxu0 %v3101_v18 }
0x16f7   :  { %3234 = vpow2.f32 %v2523_v5  ;;  %3103 = vmatprep.subr.bf16.mxu0 %v3265_v3 }
0x16fa   :  { %3105 = vmatpush3.bf16.msra.mxu0 %v3104_v20 }
0x16ff   :  { %v3233_v4 = vpop.eup %3232 }
0x1700   :  { %2359 = vrot.lane.b32.xlu0 %v3233_v4, %s3268_s25 }
0x1701   :  { %v3235_v6 = vpop.eup %3234 }
0x1702   :  { %v2353_v8 = vadd.f32 1.0, %v3235_v6 }
0x1704   :  { %3236 = vrcp.f32 %v2353_v8 }
0x170e   :  { %v3237_v9 = vpop.eup %3236 }
0x170f   :  { %v2357_v10 = vmul.f32 %v3237_v9, %v2096_v46 }
0x1772   :  { %v2360_v11 = vpop.permute.xlu0 %2359 }
0x1773   :  { %v2362_v14 = vmul.f32 %v3237_v9, %v2360_v11 }
0x1775   :  { %2364 = vrot.lane.b32.xlu1 %v2362_v14, %s3268_s25 }
0x17e7   :  { %v2365_v15 = vpop.permute.xlu1 %2364 }
0x17e8   :  { %v2367_v16 = vadd.f32 %v2365_v15, %v2357_v10 }
0x17ea   :  { %3238 = vtanh.f32 %v2367_v16 }
0x17f4   :  { %v3239_v21 = vpop.eup %3238 }
0x17f5   :  { %2370 = vrot.lane.b32.xlu0 %v3239_v21, %s3268_s25  ;;  %s3241_s25 = scalar_lea.vmem %s2469_s20, 128 }
0x17f6   :  { %p3242_p0 = scmp.ne.s32.totalorder %s2469_s20, %s3241_s25  ;;  %p3247_p2 = scmp.lt.s32.totalorder %s3241_s25, %s3241_s25 }
0x17f8   :  { %p3248_p3 = por %p3247_p2, %p3246_p1 }
0x17fa   :  { %p3249_p4 = pnand %p3248_p3, %p3242_p0 }
0x1867   :  { %v2371_v22 = vpop.permute.xlu0 %2370 }
0x1868   :  { %v2373_v7 = vmul.f32 %v3237_v9, %v2371_v22 }
0x186a   :  { %2386 = vrot.lane.b32.xlu1 %v2373_v7, %s3269_s0 }
0x18dc   :  { %v2387_v12 = vpop.permute.xlu1 %2386 }
0x18dd   :  { %2950 = vmatmul.mubr.msk.f32.vlgmr.msra.gmra.mrb[30].mxu0 %vm208_vm2, %v2387_v12 }
0x19b0   :  { %v2456_v23 = vpop.f32.mrb[30].mxu0 }
0x19b1   :  { %v2457_v3 = vadd.f32 %v2524_v37, %v2456_v23  ;;  %v2951_v24 = vpop.f32.mrb[31].mxu0 }
0x19b3   :  { %2461 = vst.msk [vmem:[#allocation3] sm:$0xff] %vm2460_vm3, %v2457_v3 }
0x19b4   :  { %3252 = shalt.err (!%p3249_p4)
}
0x19b5   :  { %s3253_s23 = scalar_lea.hbm %s3781_s9, 128 }
0x19b6   :  { %p3254_p5 = scmp.ne.s32.totalorder %s3781_s9, %s3253_s23  ;;  %p3257_p6 = scmp.lt.u32.totalorder %s3253_s23, %s3781_s9 }
0x19b8   :  { %p3259_p7 = pnand %p3257_p6, %p3254_p5 }
0x19ba   :  { %3262 = shalt.err (!%p3259_p7)
}
0x19bb   :  { %2471 = dma.vmem_to_hbm [thread:$0]  %s2469_s20, 128, %s3781_s9, [#allocation4]  }
0x19bc   :  { %3263 = dma.done.wait [#allocation4], 128  }
0x19bd   :  { %3264 = vsyncadd [#allocation4], 4294967168 }
0x19be   :  { %2475 = vsyncpa [#allocation4], 1 }

</bundles_post_ra>
